<compile_context>
chip_gen: v5e
topology: v5e:2x2
jax: 0.10.0
libtpu: 0.0.40
codegen_flags: <defaults>
</compile_context>

<pallas_src>
from functools import partial

import numpy as np
import jax
import jax.numpy as jnp
from jax import lax
from jax.experimental import pallas as pl
from jax.experimental.pallas import tpu as pltpu

TM = 256  # edge-row tile (fills the 256-wide MXU on v6e/v7x; use 128 on v5e)


# ----------------------------------------------------------------------------
# Kernel A: per-edge attention logits, already broadcast to (E, dim) layout.
#   w_b[e, c] = ( sum_{d in head(c)} q[e,d]*k[e,d]  +  sum_d pe[e,d] ) / denom[e]
# The per-head sum + broadcast is one (TM, dim) @ (dim, dim) block-diagonal
# MXU matmul; the divide is an EUP reciprocal applied to the (TM, dim) result.
# ----------------------------------------------------------------------------
def _edge_logits_kernel(q_ref, k_ref, pesum_ref, den_ref, bd_ref, w_ref):
    t = q_ref[...] * k_ref[...]                                          # VPU
    s = jnp.dot(t, bd_ref[...], preferred_element_type=jnp.float32)      # MXU
    # NOTE: on v5e cast `t` / `bd` to bf16 here for native MXU throughput.
    w_ref[...] = (s + pesum_ref[...]) * pl.reciprocal(den_ref[...], approx=True)


def _edge_logits(q, k, pe_sum, denom, blockdiag):
    E, dim = q.shape
    grid = (pl.cdiv(E, TM),)
    return pl.pallas_call(
        _edge_logits_kernel,
        out_shape=jax.ShapeDtypeStruct((E, dim), jnp.float32),
        grid=grid,
        in_specs=[
            pl.BlockSpec((TM, dim), lambda i: (i, 0)),
            pl.BlockSpec((TM, dim), lambda i: (i, 0)),
            pl.BlockSpec((TM, 1), lambda i: (i, 0)),
            pl.BlockSpec((TM, 1), lambda i: (i, 0)),
            pl.BlockSpec((dim, dim), lambda i: (0, 0)),
        ],
        out_specs=pl.BlockSpec((TM, dim), lambda i: (i, 0)),
        compiler_params=pltpu.CompilerParams(dimension_semantics=("parallel",)),
    )(q, k, pe_sum, denom, blockdiag)


# ----------------------------------------------------------------------------
# Kernel B: fused  (v + pe-broadcast) * a  followed by the per-query
# segment-sum.  The (Nq, dim) output block is resident in VMEM across all
# (sequential) edge tiles and accumulated via a one-hot(query) @ contrib MXU
# matmul, so the (E, dim) per-edge contribution never touches HBM.
# ----------------------------------------------------------------------------
def _edge_av_scatter_kernel(v_ref, pe_ref, a_ref, qid_ref, pe_sel_ref, o_ref,
                            *, n_edges):
    step = pl.program_id(0)

    @pl.when(step == 0)
    def _init():
        o_ref[...] = jnp.zeros_like(o_ref)

    tm = v_ref.shape[0]
    # pe (TM, hd) -> (TM, dim): broadcast across heads with a 0/1 selector (MXU).
    pe_b = jnp.dot(pe_ref[...], pe_sel_ref[...],
                   preferred_element_type=jnp.float32)
    contrib = (v_ref[...] + pe_b) * a_ref[...]                           # (TM, dim)

    # mask rows past the true edge count (ragged final tile -> garbage reads)
    row = lax.broadcasted_iota(jnp.int32, contrib.shape, 0) + step * tm
    contrib = jnp.where(row < n_edges, contrib, 0.0)

    # fused segment-sum: one-hot over query ids (queries on the lane axis).
    # TODO(synk): for very large Nq replace this (Nq, TM) one-hot matmul with a
    # sorted-segment row-carry accumulator to keep VMEM/MXU cost O(TM * dim).
    nq = o_ref.shape[0]
    onehot = (lax.broadcasted_iota(jnp.int32, (nq, tm), 0)
              == qid_ref[...]).astype(jnp.float32)                        # (nq, TM)
    o_ref[...] += jnp.dot(onehot, contrib, preferred_element_type=jnp.float32)


def _edge_av_segment_sum(v, pe, a_b, qid_row, pe_sel, num_queries):
    E, dim = v.shape
    hd = pe.shape[1]
    grid = (pl.cdiv(E, TM),)
    return pl.pallas_call(
        partial(_edge_av_scatter_kernel, n_edges=E),
        out_shape=jax.ShapeDtypeStruct((num_queries, dim), jnp.float32),
        grid=grid,
        in_specs=[
            pl.BlockSpec((TM, dim), lambda i: (i, 0)),
            pl.BlockSpec((TM, hd), lambda i: (i, 0)),
            pl.BlockSpec((TM, dim), lambda i: (i, 0)),
            pl.BlockSpec((1, TM), lambda i: (0, i)),
            pl.BlockSpec((hd, dim), lambda i: (0, 0)),
        ],
        out_specs=pl.BlockSpec((num_queries, dim), lambda i: (0, 0)),
        compiler_params=pltpu.CompilerParams(dimension_semantics=("arbitrary",)),
    )(v, pe, a_b, qid_row, pe_sel)


# ----------------------------------------------------------------------------
# pe MLP: Linear(3,3) + BatchNorm1d(3) (eval, folded into scale/shift) + ReLU
#         + Linear(3, dim // heads).  Tiny -> plain XLA, shared by forward and
#         the pure-JAX reference.
# ----------------------------------------------------------------------------
def _pe_mlp(params, pe_in):
    h1 = jnp.dot(pe_in, params["w1"], precision=lax.Precision.HIGHEST)
    h1 = jnp.maximum(h1 * params["s1"] + params["sh1"], 0.0)
    return jnp.dot(h1, params["w2"], precision=lax.Precision.HIGHEST) + params["b2"]


# ----------------------------------------------------------------------------
# Whole TreeAttention forward, jitted once.
# ----------------------------------------------------------------------------
@partial(jax.jit, static_argnames=("heads", "scale"))
def tree_attention_forward(params, pq, pk, Q, K, V, queries, keys, *, heads, scale):
    nq, dim = Q.shape
    hd = dim // heads
    E = queries.shape[0]

    # --- per-edge gathers (XLA) --------------------------------------------
    q = jnp.take(Q, queries, axis=0)
    k = jnp.take(K, keys, axis=0)
    v = jnp.take(V, keys, axis=0)
    pe_in = jnp.take(pq, queries, axis=0) - jnp.take(pk, keys, axis=0)    # (E, 3)

    # --- positional-encoding MLP (tiny, XLA) --------------------------------
    pe = _pe_mlp(params, pe_in)                                           # (E, hd)
    pe_sum = jnp.sum(pe, axis=1, keepdims=True)                           # (E, 1)

    # --- per-query edge count -> denominator --------------------------------
    count = jax.ops.segment_sum(jnp.ones((E,), jnp.float32), queries,
                                num_segments=nq)
    denom = (scale * jnp.take(count, queries) + 1e-8)[:, None]            # (E, 1)

    # constant selectors (constant-folded by XLA, resident in VMEM in-kernel)
    ch = jnp.arange(dim, dtype=jnp.int32)
    blockdiag = ((ch[:, None] // hd) == (ch[None, :] // hd)).astype(jnp.float32)
    pe_sel = (jnp.arange(hd, dtype=jnp.int32)[:, None]
              == (ch[None, :] % hd)).astype(jnp.float32)                  # (hd, dim)

    # --- Pallas kernel A: per-edge logits (broadcast per-head over its lanes)
    w_b = _edge_logits(q, k, pe_sum, denom, blockdiag)                    # (E, dim)

    # --- scatter-softmax over edges sharing a query (tiny XLA segment ops) --
    wmax = jax.ops.segment_max(w_b, queries, num_segments=nq)
    wexp = jnp.exp(w_b - jnp.take(wmax, queries, axis=0))
    wsum = jax.ops.segment_sum(wexp, queries, num_segments=nq)
    a_b = wexp / jnp.take(wsum, queries, axis=0)                          # (E, dim)

    # --- Pallas kernel B: (v + pe)*a with fused per-query segment-sum -------
    qid_row = queries[None, :].astype(jnp.int32)                          # (1, E)
    out = _edge_av_segment_sum(v, pe, a_b, qid_row, pe_sel, nq)           # (nq, dim)
    return out


# ----------------------------------------------------------------------------
# Pure-JAX reference (mirrors the PyTorch module, BN folded the same way).
# ----------------------------------------------------------------------------
@partial(jax.jit, static_argnames=("heads", "scale"))
def tree_attention_reference(params, pq, pk, Q, K, V, queries, keys, *, heads, scale):
    nq, dim = Q.shape
    hd = dim // heads
    E = queries.shape[0]
    q = jnp.take(Q, queries, axis=0).reshape(E, heads, hd)
    k = jnp.take(K, keys, axis=0).reshape(E, heads, hd)
    v = jnp.take(V, keys, axis=0).reshape(E, heads, hd)
    pe = _pe_mlp(params, jnp.take(pq, queries, axis=0) - jnp.take(pk, keys, axis=0))
    count = jax.ops.segment_sum(jnp.ones((E,), jnp.float32), queries,
                                num_segments=nq)
    cnt = jnp.take(count, queries)[:, None, None]
    w = ((k * q + pe[:, None, :]) / (scale * cnt + 1e-8)).sum(-1)         # (E, heads)
    wmax = jax.ops.segment_max(w, queries, num_segments=nq)
    a = jnp.exp(w - jnp.take(wmax, queries, axis=0))
    asum = jax.ops.segment_sum(a, queries, num_segments=nq)
    a = a / jnp.take(asum, queries, axis=0)
    vv = (v + pe[:, None, :]) * a[:, :, None]
    out = jax.ops.segment_sum(vv, queries, num_segments=nq).reshape(nq, dim)
    return out


# ----------------------------------------------------------------------------
# Main: deterministic small synthetic tree-edge problem.
# ----------------------------------------------------------------------------
if __name__ == "__main__":
    heads, dim = 4, 64
    hd = dim // heads
    scale = float(np.sqrt(dim))

    nq, nk, knn = 160, 32, 4          # 160 query nodes, 32 key nodes, 4 edges each
    E = nq * knn                      # 640 edges -> 3 row-tiles (last one ragged)

    key = jax.random.PRNGKey(0)
    (k_pq, k_pk, k_q, k_k, k_v,
     k_w1, k_b1, k_g, k_beta, k_w2, k_b2) = jax.random.split(key, 11)

    pq = jax.random.normal(k_pq, (nq, 3), jnp.float32)
    pk = jax.random.normal(k_pk, (nk, 3), jnp.float32)
    Q = jax.random.normal(k_q, (nq, dim), jnp.float32)
    K = jax.random.normal(k_k, (nk, dim), jnp.float32)
    V = jax.random.normal(k_v, (nk, dim), jnp.float32)

    # edge list m[:, 0]=query, m[:, 1]=key; rows sorted by query (segment_coo style)
    q_idx = np.repeat(np.arange(nq, dtype=np.int32), knn)
    k_idx = (np.tile(np.arange(knn, dtype=np.int32), nq) + q_idx) % nk
    m = np.stack([q_idx, k_idx], axis=1)                                  # (E, 2)
    queries = jnp.asarray(m[:, 0], jnp.int32)
    keys = jnp.asarray(m[:, 1], jnp.int32)

    # pe_mlp params; eval-mode BatchNorm1d (running stats 0/1) folded into
    # per-channel scale/shift at build time (no per-call padding/folding).
    w1 = jax.random.normal(k_w1, (3, 3), jnp.float32) / np.sqrt(3.0)
    b1 = 0.1 * jax.random.normal(k_b1, (3,), jnp.float32)
    gamma = 1.0 + 0.1 * jax.random.normal(k_g, (3,), jnp.float32)
    beta = 0.1 * jax.random.normal(k_beta, (3,), jnp.float32)
    s1 = gamma / np.sqrt(1.0 + 1e-5)
    sh1 = b1 * s1 + beta
    w2 = jax.random.normal(k_w2, (3, hd), jnp.float32) / np.sqrt(3.0)
    b2 = 0.1 * jax.random.normal(k_b2, (hd,), jnp.float32)
    params = dict(w1=w1, s1=s1, sh1=sh1, w2=w2, b2=b2)

    out = tree_attention_forward(params, pq, pk, Q, K, V, queries, keys,
                                 heads=heads, scale=scale)
    out = jax.block_until_ready(out)

    ref = tree_attention_reference(params, pq, pk, Q, K, V, queries, keys,
                                   heads=heads, scale=scale)
    ref = jax.block_until_ready(ref)

    out_np, ref_np = np.asarray(out), np.asarray(ref)
    assert out_np.shape == (nq, dim)
    assert np.all(np.isfinite(out_np))
    max_err = float(np.max(np.abs(out_np - ref_np)))
    assert np.allclose(out_np, ref_np, rtol=2e-2, atol=2e-2), max_err
    print("KERNEL_OK")
</pallas_src>

<mosaic_0001>
module attributes {stable_mosaic.version = 11 : i64} {
  func.func @_edge_logits_kernel(%arg0: i32, %arg1: memref<256x64xf32, #tpu.memory_space<vmem>>, %arg2: memref<256x64xf32, #tpu.memory_space<vmem>>, %arg3: memref<256x1xf32, #tpu.memory_space<vmem>>, %arg4: memref<256x1xf32, #tpu.memory_space<vmem>>, %arg5: memref<64x64xf32, #tpu.memory_space<vmem>>, %arg6: memref<256x64xf32, #tpu.memory_space<vmem>>) attributes {dimension_semantics = [#tpu.dimension_semantics<parallel>], iteration_bounds = array<i64: 3>, scalar_prefetch = 0 : i64, scratch_operands = 0 : i64, tpu.core_type = #tpu.core_type<tc>, window_params = [{transform_indices = @transform_0, window_bounds = array<i64: 256, 64>}, {transform_indices = @transform_1, window_bounds = array<i64: 256, 64>}, {transform_indices = @transform_2, window_bounds = array<i64: 256, 1>}, {transform_indices = @transform_3, window_bounds = array<i64: 256, 1>}, {pipeline_mode = #tpu.pipeline_mode<synchronous>, transform_indices = @transform_4, window_bounds = array<i64: 64, 64>}, {transform_indices = @transform_5, window_bounds = array<i64: 256, 64>}]} {
    %c0 = arith.constant 0 : index
    %c0_0 = arith.constant 0 : index
    %0 = vector.load %arg1[%c0, %c0_0] : memref<256x64xf32, #tpu.memory_space<vmem>>, vector<256x64xf32>
    %c0_1 = arith.constant 0 : index
    %c0_2 = arith.constant 0 : index
    %1 = vector.load %arg2[%c0_1, %c0_2] : memref<256x64xf32, #tpu.memory_space<vmem>>, vector<256x64xf32>
    %2 = arith.mulf %0, %1 : vector<256x64xf32>
    %c0_3 = arith.constant 0 : index
    %c0_4 = arith.constant 0 : index
    %3 = vector.load %arg5[%c0_3, %c0_4] : memref<64x64xf32, #tpu.memory_space<vmem>>, vector<64x64xf32>
    %cst = arith.constant dense<0.000000e+00> : vector<256x64xf32>
    %4 = tpu.matmul %2, %3, %cst {dimension_numbers = #tpu.dot_dimension_numbers<[1], [0], [0], [1], [0, 0, 1, 1], [], []>} : vector<256x64xf32>, vector<64x64xf32>, vector<256x64xf32> -> vector<256x64xf32>
    %c0_5 = arith.constant 0 : index
    %c0_6 = arith.constant 0 : index
    %5 = vector.load %arg3[%c0_5, %c0_6] : memref<256x1xf32, #tpu.memory_space<vmem>>, vector<256x1xf32>
    %6 = vector.broadcast %5 : vector<256x1xf32> to vector<256x64xf32>
    %7 = arith.addf %4, %6 : vector<256x64xf32>
    %c0_7 = arith.constant 0 : index
    %c0_8 = arith.constant 0 : index
    %8 = vector.load %arg4[%c0_7, %c0_8] : memref<256x1xf32, #tpu.memory_space<vmem>>, vector<256x1xf32>
    %9 = tpu.reciprocal %8 {approx = true} : vector<256x1xf32> -> vector<256x1xf32>
    %10 = vector.broadcast %9 : vector<256x1xf32> to vector<256x64xf32>
    %11 = arith.mulf %7, %10 : vector<256x64xf32>
    %c0_9 = arith.constant 0 : index
    %c0_10 = arith.constant 0 : index
    %12 = vector.load %arg6[%c0_9, %c0_10] : memref<256x64xf32, #tpu.memory_space<vmem>>, vector<256x64xf32>
    tpu.vector_store %arg6[%c0_9, %c0_10], %11 {strides = array<i32>} : memref<256x64xf32, #tpu.memory_space<vmem>>, vector<256x64xf32>,
    return
  }
  func.func @transform_0(%arg0: i32) -> (i32, i32) {
    %c0_i32 = arith.constant 0 : i32
    %c0_i32_0 = arith.constant 0 : i32
    return %arg0, %c0_i32 : i32, i32
  }
  func.func @transform_1(%arg0: i32) -> (i32, i32) {
    %c0_i32 = arith.constant 0 : i32
    %c0_i32_0 = arith.constant 0 : i32
    return %arg0, %c0_i32 : i32, i32
  }
  func.func @transform_2(%arg0: i32) -> (i32, i32) {
    %c0_i32 = arith.constant 0 : i32
    %c0_i32_0 = arith.constant 0 : i32
    return %arg0, %c0_i32 : i32, i32
  }
  func.func @transform_3(%arg0: i32) -> (i32, i32) {
    %c0_i32 = arith.constant 0 : i32
    %c0_i32_0 = arith.constant 0 : i32
    return %arg0, %c0_i32 : i32, i32
  }
  func.func @transform_4(%arg0: i32) -> (i32, i32) {
    %c0_i32 = arith.constant 0 : i32
    %c0_i32_0 = arith.constant 0 : i32
    %c0_i32_1 = arith.constant 0 : i32
    return %c0_i32, %c0_i32_0 : i32, i32
  }
  func.func @transform_5(%arg0: i32) -> (i32, i32) {
    %c0_i32 = arith.constant 0 : i32
    %c0_i32_0 = arith.constant 0 : i32
    return %arg0, %c0_i32 : i32, i32
  }
}

module attributes {stable_mosaic.version = 11 : i64} {
  func.func @_edge_av_scatter_kernel(%arg0: i32, %arg1: memref<256x64xf32, #tpu.memory_space<vmem>>, %arg2: memref<256x16xf32, #tpu.memory_space<vmem>>, %arg3: memref<256x64xf32, #tpu.memory_space<vmem>>, %arg4: memref<1x256xi32, #tpu.memory_space<vmem>>, %arg5: memref<16x64xf32, #tpu.memory_space<vmem>>, %arg6: memref<160x64xf32, #tpu.memory_space<vmem>>) attributes {dimension_semantics = [#tpu.dimension_semantics<arbitrary>], iteration_bounds = array<i64: 3>, scalar_prefetch = 0 : i64, scratch_operands = 0 : i64, tpu.core_type = #tpu.core_type<tc>, window_params = [{transform_indices = @transform_0, window_bounds = array<i64: 256, 64>}, {transform_indices = @transform_1, window_bounds = array<i64: 256, 16>}, {transform_indices = @transform_2, window_bounds = array<i64: 256, 64>}, {transform_indices = @transform_3, window_bounds = array<i64: 1, 256>}, {pipeline_mode = #tpu.pipeline_mode<synchronous>, transform_indices = @transform_4, window_bounds = array<i64: 16, 64>}, {pipeline_mode = #tpu.pipeline_mode<synchronous>, transform_indices = @transform_5, window_bounds = array<i64: 160, 64>}]} {
    %c0_i32 = arith.constant 0 : i32
    %0 = arith.cmpi eq, %arg0, %c0_i32 : i32
    %1 = arith.extui %0 : i1 to i32
    %c0_i32_0 = arith.constant 0 : i32
    %2 = arith.cmpi ne, %1, %c0_i32_0 : i32
    scf.if %2 {
      %cst_16 = arith.constant 0.000000e+00 : f32
      %28 = vector.broadcast %cst_16 : f32 to vector<160x64xf32>
      %c0_17 = arith.constant 0 : index
      %c0_18 = arith.constant 0 : index
      %29 = vector.load %arg6[%c0_17, %c0_18] : memref<160x64xf32, #tpu.memory_space<vmem>>, vector<160x64xf32>
      tpu.vector_store %arg6[%c0_17, %c0_18], %28 {strides = array<i32>} : memref<160x64xf32, #tpu.memory_space<vmem>>, vector<160x64xf32>,
    } else {
    }
    %c0 = arith.constant 0 : index
    %c0_1 = arith.constant 0 : index
    %3 = vector.load %arg2[%c0, %c0_1] : memref<256x16xf32, #tpu.memory_space<vmem>>, vector<256x16xf32>
    %c0_2 = arith.constant 0 : index
    %c0_3 = arith.constant 0 : index
    %4 = vector.load %arg5[%c0_2, %c0_3] : memref<16x64xf32, #tpu.memory_space<vmem>>, vector<16x64xf32>
    %cst = arith.constant dense<0.000000e+00> : vector<256x64xf32>
    %5 = tpu.matmul %3, %4, %cst {dimension_numbers = #tpu.dot_dimension_numbers<[1], [0], [0], [1], [0, 0, 1, 1], [], []>} : vector<256x16xf32>, vector<16x64xf32>, vector<256x64xf32> -> vector<256x64xf32>
    %c0_4 = arith.constant 0 : index
    %c0_5 = arith.constant 0 : index
    %6 = vector.load %arg1[%c0_4, %c0_5] : memref<256x64xf32, #tpu.memory_space<vmem>>, vector<256x64xf32>
    %7 = arith.addf %6, %5 : vector<256x64xf32>
    %c0_6 = arith.constant 0 : index
    %c0_7 = arith.constant 0 : index
    %8 = vector.load %arg3[%c0_6, %c0_7] : memref<256x64xf32, #tpu.memory_space<vmem>>, vector<256x64xf32>
    %9 = arith.mulf %7, %8 : vector<256x64xf32>
    %10 = tpu.iota {dimensions = array<i32: 0>} : vector<256x64xi32>
    %c256_i32 = arith.constant 256 : i32
    %11 = arith.muli %arg0, %c256_i32 : i32
    %12 = vector.broadcast %11 : i32 to vector<256x64xi32>
    %13 = arith.addi %10, %12 : vector<256x64xi32>
    %c640_i32 = arith.constant 640 : i32
    %14 = vector.broadcast %c640_i32 : i32 to vector<256x64xi32>
    %15 = arith.cmpi slt, %13, %14 : vector<256x64xi32>
    %cst_8 = arith.constant 0.000000e+00 : f32
    %16 = vector.broadcast %cst_8 : f32 to vector<256x64xf32>
    %17 = arith.select %15, %9, %16 : vector<256x64xi1>, vector<256x64xf32>
    %18 = tpu.iota {dimensions = array<i32: 0>} : vector<160x256xi32>
    %c0_9 = arith.constant 0 : index
    %c0_10 = arith.constant 0 : index
    %19 = vector.load %arg4[%c0_9, %c0_10] : memref<1x256xi32, #tpu.memory_space<vmem>>, vector<1x256xi32>
    %20 = vector.broadcast %19 : vector<1x256xi32> to vector<160x256xi32>
    %21 = arith.cmpi eq, %18, %20 : vector<160x256xi32>
    %22 = arith.extui %21 : vector<160x256xi1> to vector<160x256xi32>
    %23 = arith.sitofp %22 : vector<160x256xi32> to vector<160x256xf32>
    %c0_11 = arith.constant 0 : index
    %c0_12 = arith.constant 0 : index
    %24 = vector.load %arg6[%c0_11, %c0_12] : memref<160x64xf32, #tpu.memory_space<vmem>>, vector<160x64xf32>
    %cst_13 = arith.constant dense<0.000000e+00> : vector<160x64xf32>
    %25 = tpu.matmul %23, %17, %cst_13 {dimension_numbers = #tpu.dot_dimension_numbers<[1], [0], [0], [1], [0, 0, 1, 1], [], []>} : vector<160x256xf32>, vector<256x64xf32>, vector<160x64xf32> -> vector<160x64xf32>
    %26 = arith.addf %24, %25 : vector<160x64xf32>
    %c0_14 = arith.constant 0 : index
    %c0_15 = arith.constant 0 : index
    %27 = vector.load %arg6[%c0_14, %c0_15] : memref<160x64xf32, #tpu.memory_space<vmem>>, vector<160x64xf32>
    tpu.vector_store %arg6[%c0_14, %c0_15], %26 {strides = array<i32>} : memref<160x64xf32, #tpu.memory_space<vmem>>, vector<160x64xf32>,
    return
  }
  func.func @transform_0(%arg0: i32) -> (i32, i32) {
    %c0_i32 = arith.constant 0 : i32
    %c0_i32_0 = arith.constant 0 : i32
    return %arg0, %c0_i32 : i32, i32
  }
  func.func @transform_1(%arg0: i32) -> (i32, i32) {
    %c0_i32 = arith.constant 0 : i32
    %c0_i32_0 = arith.constant 0 : i32
    return %arg0, %c0_i32 : i32, i32
  }
  func.func @transform_2(%arg0: i32) -> (i32, i32) {
    %c0_i32 = arith.constant 0 : i32
    %c0_i32_0 = arith.constant 0 : i32
    return %arg0, %c0_i32 : i32, i32
  }
  func.func @transform_3(%arg0: i32) -> (i32, i32) {
    %c0_i32 = arith.constant 0 : i32
    %c0_i32_0 = arith.constant 0 : i32
    return %c0_i32, %arg0 : i32, i32
  }
  func.func @transform_4(%arg0: i32) -> (i32, i32) {
    %c0_i32 = arith.constant 0 : i32
    %c0_i32_0 = arith.constant 0 : i32
    %c0_i32_1 = arith.constant 0 : i32
    return %c0_i32, %c0_i32_0 : i32, i32
  }
  func.func @transform_5(%arg0: i32) -> (i32, i32) {
    %c0_i32 = arith.constant 0 : i32
    %c0_i32_0 = arith.constant 0 : i32
    %c0_i32_1 = arith.constant 0 : i32
    return %c0_i32, %c0_i32_0 : i32, i32
  }
}

</mosaic_0001>

<bundles_post_ra>
// kernel: tree_attention_forward.2
= control target key start
LH: loop header
LB: loop body
LE: loop exit
PB: predicated region body
PF: predicated region fallthrough
CT: control target
= control target key end

     0   :  { %s1906_s18 = smov 0   ;;  %s1908_s19 = smov 0   ;;  %s2494_s0 = inlined_call_operand.vmem [shape: f32[640,64], index: 0, kind: input, shape index: {}]   ;;  %s2495_s1 = inlined_call_operand.vmem [shape: f32[640,64], index: 1, kind: input, shape index: {}]   ;;  %s2496_s2 = inlined_call_operand.vmem [shape: f32[640,1], index: 2, kind: input, shape index: {}]   ;;  %s2497_s3 = inlined_call_operand.vmem [shape: f32[640,1], index: 3, kind: input, shape index: {}]   ;;  %s2498_s4 = inlined_call_operand.vmem [shape: f32[64,64], index: 4, kind: input, shape index: {}]   ;;  %s2499_s5 = inlined_call_operand.vmem [shape: f32[640,64], index: 5, kind: output, shape index: {}]  }
   0x1   :  { %s1910_s20 = smov 0  }
   0x2 LB: > { %s1919_s21 = sadd.s32 4294967295, %s1841_s20   ;;  %s1921_s22 = sadd.s32 1, %s1841_s20   ;;  %s1841_s20 = sphi %s1910_s20, %s2508_s20   ;;  %s1837_s19 = sphi %s1908_s19, %s2507_s19   ;;  %s1833_s18 = sphi %s1906_s18, %s2506_s18  }
   0x3   : > { %s144_s23 = ssub.s32 %s1841_s20, %s1921_s22  ;;  %s147_s24 = sadd.s32 1, %s1837_s19 }
   0x4   : > { %p145_p0 = scmp.eq.s32.totalorder %s144_s23, 0  ;;  %p157_p1 = scmp.ne.s32.totalorder %s1837_s19, %s1833_s18 }
   0x5   : > { %p158_p2 = scmp.eq.s32.totalorder %s1919_s21, 2  ;;  %p1545_p3 = scmp.ge.s32.totalorder %s1841_s20, 1 }
   0x6   : > { %s1929_s25 = scalar_select %p145_p0, %s1837_s19, %s147_s24  }
   0x7   : > { %p1931_p4 = por %p158_p2, %p157_p1  ;;  %p253_p5 = scmp.lt.s32.totalorder %s1841_s20, 4 }
   0x9   : > { %p254_p6 = pnand %p1545_p3, %p253_p5 }
   0xa   : > { %s1942_s6 = sshll.u32 (!%p254_p6), %s1919_s21, 5 }
   0xb   : > { %257 = sbr.rel (%p254_p6) target bundleno = 379 (0x17b), region = 40  ;;  %p316_p7 = scmp.lt.s32.totalorder (!%p254_p6), %s1942_s6, 79 }
  0x10   : > { %v475_v0 = vld [vmem:[%s2498_s4 + $0x38] sm:$0xff]  ;;  %v474_v1 = vld [vmem:[%s2498_s4 + $0x30] sm:$0xff]  ;;  %v473_v2 = vld [vmem:[%s2498_s4 + $0x28] sm:$0xff]  ;;  %s317_s9 = scalar_select %p316_p7, %s1942_s6, 79  ;;  %v1875_v4 = vmov 0   ;;  %vm668_vm0 = vcmask 523264  }
  0x11   : > { %773 = vmatpush.msra.mxu0 %v475_v0  ;;  %1607 = vmatpush.msra.mxu1 %v475_v0  ;;  %v472_v3 = vld [vmem:[%s2498_s4 + $0x20] sm:$0xff]  ;;  %v471_v8 = vld [vmem:[%s2498_s4 + $0x18] sm:$0xff]  ;;  %v470_v9 = vld [vmem:[%s2498_s4 + $0x10] sm:$0xff]  ;;  %s1604_s20 = sshll.u32 (%p1931_p4), %s1919_s21, 8 }
  0x12   : > { %1608 = vmatpush.msra.mxu2 %v475_v0  ;;  %1609 = vmatpush.msra.mxu3 %v475_v0  ;;  %s1952_s12 = sshll.u32 %s317_s9, 3  ;;  %v469_v10 = vld [vmem:[%s2498_s4 + $0x8] sm:$0xff]  ;;  %v468_v11 = vld [vmem:[%s2498_s4] sm:$0xff]  ;;  %s2359_s27 = scalar_lea.vmem (%p1931_p4), %s2499_s5, %s1604_s20  }
  0x13   : > { %774 = vmatpush.msra.mxu0 %v474_v1  ;;  %1610 = vmatpush.msra.mxu1 %v474_v1  ;;  %s1958_s15 = scalar_lea.vmem %s2496_s2, %s1952_s12  ;;  %s1973_s28 = scalar_lea.vmem %s2494_s0, %s1952_s12 }
  0x14   : > { %1611 = vmatpush.msra.mxu2 %v474_v1  ;;  %1612 = vmatpush.msra.mxu3 %v474_v1  ;;  %v480_v5 = vld [vmem:[%s1958_s15 + $0x20] sm:$0xff]  ;;  %v478_v6 = vld [vmem:[%s1958_s15 + $0x10] sm:$0xff]  ;;  %s1979_s7 = scalar_lea.vmem %s2495_s1, %s1952_s12  ;;  %v481_v20 = vld [vmem:[%s1958_s15 + $0x28] sm:$0xff]  ;;  %s2107_s16 = scalar_lea.vmem %s2497_s3, %s1952_s12 }
  0x15   : > { %775 = vmatpush.msra.mxu0 %v473_v2  ;;  %1613 = vmatpush.msra.mxu1 %v473_v2  ;;  %v476_v7 = vld [vmem:[%s1958_s15] sm:$0xff]  ;;  %v479_v21 = vld [vmem:[%s1958_s15 + $0x18] sm:$0xff]  ;;  %v477_v23 = vld [vmem:[%s1958_s15 + $0x8] sm:$0xff]  ;;  %s308_s12 = sand.u32 1, %s1833_s18   ;;  %s1174_s18 = ssub.s32 (%p1931_p4), 80, %s1942_s6 }
  0x16   : > { %1614 = vmatpush.msra.mxu2 %v473_v2  ;;  %1615 = vmatpush.msra.mxu3 %v473_v2  ;;  %v372_v12 = vld [vmem:[%s1973_s28] sm:$0xff]  ;;  %v373_v27 = vld [vmem:[%s1973_s28 + $0x8] sm:$0xff]  ;;  %v483_v36 = vld [vmem:[%s1958_s15 + $0x38] sm:$0xff]  ;;  %p1175_p8 = scmp.lt.s32.totalorder (%p1931_p4), %s1174_s18, 32 }
  0x17   : > { %1722 = vset.pattern.permute.xlu2 %v1875_v4  ;;  %1721 = vset.pattern.permute.xlu1 %v1875_v4  ;;  %v404_v13 = vld [vmem:[%s1979_s7] sm:$0xff]  ;;  %v405_v28 = vld [vmem:[%s1979_s7 + $0x8] sm:$0xff]  ;;  %v482_v38 = vld [vmem:[%s1958_s15 + $0x30] sm:$0xff] }
  0x18   : > { %1720 = vset.pattern.permute.xlu0 %v1875_v4  ;;  %776 = vmatpush.msra.mxu0 %v472_v3  ;;  %v380_v14 = vld [vmem:[%s1973_s28 + $0x40] sm:$0xff]  ;;  %v436_v22 = vmul.f32 %v404_v13, %v372_v12  ;;  %v381_v29 = vld [vmem:[%s1973_s28 + $0x48] sm:$0xff]  ;;  %v437_v37 = vmul.f32 %v405_v28, %v373_v27  ;;  %v374_v42 = vld [vmem:[%s1973_s28 + $0x10] sm:$0xff] }
  0x19   : > { %1616 = vmatpush.msra.mxu1 %v472_v3  ;;  %1617 = vmatpush.msra.mxu2 %v472_v3  ;;  %v412_v15 = vld [vmem:[%s1979_s7 + $0x40] sm:$0xff]  ;;  %v413_v30 = vld [vmem:[%s1979_s7 + $0x48] sm:$0xff]  ;;  %v406_v43 = vld [vmem:[%s1979_s7 + $0x10] sm:$0xff] }
  0x1a   : > { %1618 = vmatpush.msra.mxu3 %v472_v3  ;;  %530 = vperm.xlu2 %1722, %v480_v5   ;;  %v388_v16 = vld [vmem:[%s1973_s28 + $0x80] sm:$0xff]  ;;  %v444_v24 = vmul.f32 %v412_v15, %v380_v14  ;;  %v389_v31 = vld [vmem:[%s1973_s28 + $0x88] sm:$0xff]  ;;  %v445_v39 = vmul.f32 %v413_v30, %v381_v29  ;;  %v382_v44 = vld [vmem:[%s1973_s28 + $0x50] sm:$0xff]  ;;  %v438_v52 = vmul.f32 %v406_v43, %v374_v42 }
  0x1b   : > { %520 = vperm.xlu1 %1721, %v478_v6   ;;  %510 = vperm.xlu0 %1720, %v476_v7   ;;  %v420_v17 = vld [vmem:[%s1979_s7 + $0x80] sm:$0xff]  ;;  %v421_v32 = vld [vmem:[%s1979_s7 + $0x88] sm:$0xff]  ;;  %v414_v45 = vld [vmem:[%s1979_s7 + $0x50] sm:$0xff] }
  0x1c   : > { %777 = vmatpush.msra.mxu0 %v471_v8  ;;  %1619 = vmatpush.msra.mxu1 %v471_v8  ;;  %v396_v18 = vld [vmem:[%s1973_s28 + $0xc0] sm:$0xff]  ;;  %v452_v25 = vmul.f32 %v420_v17, %v388_v16  ;;  %v397_v33 = vld [vmem:[%s1973_s28 + $0xc8] sm:$0xff]  ;;  %v453_v40 = vmul.f32 %v421_v32, %v389_v31  ;;  %v390_v46 = vld [vmem:[%s1973_s28 + $0x90] sm:$0xff]  ;;  %v446_v54 = vmul.f32 %v414_v45, %v382_v44 }
  0x1d   : > { %1620 = vmatpush.msra.mxu2 %v471_v8  ;;  %1621 = vmatpush.msra.mxu3 %v471_v8  ;;  %v428_v19 = vld [vmem:[%s1979_s7 + $0xc0] sm:$0xff]  ;;  %v429_v34 = vld [vmem:[%s1979_s7 + $0xc8] sm:$0xff]  ;;  %v422_v47 = vld [vmem:[%s1979_s7 + $0x90] sm:$0xff] }
  0x1e   : > { %778 = vmatpush.msra.mxu0 %v470_v9  ;;  %1622 = vmatpush.msra.mxu1 %v470_v9  ;;  %v460_v26 = vmul.f32 %v428_v19, %v396_v18  ;;  %v484_v35 = vld [vmem:[%s1958_s15 + $0x40] sm:$0xff]  ;;  %v461_v41 = vmul.f32 %v429_v34, %v397_v33  ;;  %v398_v48 = vld [vmem:[%s1973_s28 + $0xd0] sm:$0xff]  ;;  %v487_v50 = vld [vmem:[%s1958_s15 + $0x58] sm:$0xff]  ;;  %v454_v55 = vmul.f32 %v422_v47, %v390_v46 }
  0x1f   : > { %1623 = vmatpush.msra.mxu2 %v470_v9  ;;  %1624 = vmatpush.msra.mxu3 %v470_v9  ;;  %v430_v49 = vld [vmem:[%s1979_s7 + $0xd0] sm:$0xff]  ;;  %v485_v53 = vld [vmem:[%s1958_s15 + $0x48] sm:$0xff]  ;;  %v375_v57 = vld [vmem:[%s1973_s28 + $0x18] sm:$0xff] }
  0x20   : > { %779 = vmatpush.msra.mxu0 %v469_v10  ;;  %1625 = vmatpush.msra.mxu1 %v469_v10  ;;  %v486_v51 = vld [vmem:[%s1958_s15 + $0x50] sm:$0xff]  ;;  %v462_v56 = vmul.f32 %v430_v49, %v398_v48  ;;  %v407_v58 = vld [vmem:[%s1979_s7 + $0x18] sm:$0xff]  ;;  %v489_v2 = vld [vmem:[%s1958_s15 + $0x68] sm:$0xff] }
  0x21   : > { %1626 = vmatpush.msra.mxu2 %v469_v10  ;;  %1627 = vmatpush.msra.mxu3 %v469_v10  ;;  %v383_v59 = vld [vmem:[%s1973_s28 + $0x58] sm:$0xff]  ;;  %v490_v1 = vld [vmem:[%s1958_s15 + $0x70] sm:$0xff]  ;;  %v439_v3 = vmul.f32 %v407_v58, %v375_v57  ;;  %v488_v4 = vld [vmem:[%s1958_s15 + $0x60] sm:$0xff] }
  0x22   : > { %780 = vmatpush.msra.mxu0 %v468_v11  ;;  %1628 = vmatpush.msra.mxu1 %v468_v11  ;;  %v415_v60 = vld [vmem:[%s1979_s7 + $0x58] sm:$0xff]  ;;  %v376_v8 = vld [vmem:[%s1973_s28 + $0x20] sm:$0xff]  ;;  %v493_v16 = vld [vmem:[%s1958_s15 + $0x88] sm:$0xff] }
  0x23   : > { %1629 = vmatpush.msra.mxu2 %v468_v11  ;;  %1630 = vmatpush.msra.mxu3 %v468_v11  ;;  %v391_v61 = vld [vmem:[%s1973_s28 + $0x98] sm:$0xff]  ;;  %v447_v5 = vmul.f32 %v415_v60, %v383_v59  ;;  %v408_v9 = vld [vmem:[%s1979_s7 + $0x20] sm:$0xff]  ;;  %v393_v27 = vld [vmem:[%s1973_s28 + $0xa8] sm:$0xff] }
  0x24   : > { %535 = vperm.xlu2 %1722, %v481_v20   ;;  %525 = vperm.xlu1 %1721, %v479_v21   ;;  %v423_v62 = vld [vmem:[%s1979_s7 + $0x98] sm:$0xff]  ;;  %v384_v10 = vld [vmem:[%s1973_s28 + $0x60] sm:$0xff]  ;;  %v440_v18 = vmul.f32 %v408_v9, %v376_v8  ;;  %v425_v28 = vld [vmem:[%s1979_s7 + $0xa8] sm:$0xff] }
  0x25   : > { %515 = vperm.xlu0 %1720, %v477_v23   ;;  %1555 = vmatmul.msk.f32.vlgmr.msra.gmra.mxu0 %vm668_vm0, %v436_v22  ;;  %v399_v63 = vld [vmem:[%s1973_s28 + $0xd8] sm:$0xff]  ;;  %v455_v6 = vmul.f32 %v423_v62, %v391_v61  ;;  %v416_v11 = vld [vmem:[%s1979_s7 + $0x60] sm:$0xff]  ;;  %v377_v23 = vld [vmem:[%s1973_s28 + $0x28] sm:$0xff] }
  0x26   : > { %1563 = vmatmul.msk.f32.vlgmr.msra.gmra.mxu1 %vm668_vm0, %v444_v24  ;;  %1571 = vmatmul.msk.f32.vlgmr.msra.gmra.mxu2 %vm668_vm0, %v452_v25  ;;  %v431_v0 = vld [vmem:[%s1979_s7 + $0xd8] sm:$0xff]  ;;  %v392_v12 = vld [vmem:[%s1973_s28 + $0xa0] sm:$0xff]  ;;  %v448_v20 = vmul.f32 %v416_v11, %v384_v10  ;;  %v409_v24 = vld [vmem:[%s1979_s7 + $0x28] sm:$0xff] }
  0x27   : > { %1579 = vmatmul.msk.f32.vlgmr.msra.gmra.mxu3 %vm668_vm0, %v460_v26  ;;  %v463_v7 = vmul.f32 %v431_v0, %v399_v63  ;;  %v424_v13 = vld [vmem:[%s1979_s7 + $0xa0] sm:$0xff]  ;;  %v491_v19 = vld [vmem:[%s1958_s15 + $0x78] sm:$0xff]  ;;  %v385_v25 = vld [vmem:[%s1973_s28 + $0x68] sm:$0xff]  ;;  %v441_v33 = vmul.f32 %v409_v24, %v377_v23 }
  0x28   : > { %v400_v14 = vld [vmem:[%s1973_s28 + $0xe0] sm:$0xff]  ;;  %v456_v21 = vmul.f32 %v424_v13, %v392_v12  ;;  %v417_v26 = vld [vmem:[%s1979_s7 + $0x68] sm:$0xff]  ;;  %v495_v32 = vld [vmem:[%s1958_s15 + $0x98] sm:$0xff] }
  0x29   : > { %v432_v15 = vld [vmem:[%s1979_s7 + $0xe0] sm:$0xff]  ;;  %v401_v29 = vld [vmem:[%s1973_s28 + $0xe8] sm:$0xff]  ;;  %v494_v34 = vld [vmem:[%s1958_s15 + $0x90] sm:$0xff] }
  0x2a   : > { %v492_v17 = vld [vmem:[%s1958_s15 + $0x80] sm:$0xff]  ;;  %v464_v22 = vmul.f32 %v432_v15, %v400_v14  ;;  %v433_v30 = vld [vmem:[%s1979_s7 + $0xe8] sm:$0xff]  ;;  %v394_v42 = vld [vmem:[%s1973_s28 + $0xb0] sm:$0xff] }
  0x2b   : > { %v496_v31 = vld [vmem:[%s1958_s15 + $0xa0] sm:$0xff]  ;;  %v426_v43 = vld [vmem:[%s1979_s7 + $0xb0] sm:$0xff]  ;;  %v499_v46 = vld [vmem:[%s1958_s15 + $0xb8] sm:$0xff] }
  0x2c   : > { %550 = vperm.xlu2 %1722, %v484_v35   ;;  %545 = vperm.xlu1 %1721, %v483_v36   ;;  %v449_v35 = vmul.f32 %v417_v26, %v385_v25  ;;  %v457_v36 = vmul.f32 %v425_v28, %v393_v27  ;;  %v402_v44 = vld [vmem:[%s1973_s28 + $0xf0] sm:$0xff]  ;;  %v497_v49 = vld [vmem:[%s1958_s15 + $0xa8] sm:$0xff]  ;;  %v395_v57 = vld [vmem:[%s1973_s28 + $0xb8] sm:$0xff] }
  0x2d   : > { %540 = vperm.xlu0 %1720, %v482_v38   ;;  %1556 = vmatmul.msk.f32.gmra.mxu0 %vm668_vm0, %v437_v37  ;;  %v465_v37 = vmul.f32 %v433_v30, %v401_v29  ;;  %v378_v38 = vld [vmem:[%s1973_s28 + $0x30] sm:$0xff]  ;;  %v427_v58 = vld [vmem:[%s1979_s7 + $0xb8] sm:$0xff]  ;;  %v501_v62 = vld [vmem:[%s1958_s15 + $0xc8] sm:$0xff] }
  0x2e   : > { %1564 = vmatmul.msk.f32.gmra.mxu1 %vm668_vm0, %v445_v39  ;;  %1572 = vmatmul.msk.f32.gmra.mxu2 %vm668_vm0, %v453_v40  ;;  %v410_v39 = vld [vmem:[%s1979_s7 + $0x30] sm:$0xff]  ;;  %v403_v59 = vld [vmem:[%s1973_s28 + $0xf8] sm:$0xff]  ;;  %v500_v0 = vld [vmem:[%s1958_s15 + $0xc0] sm:$0xff] }
  0x2f   : > { %1580 = vmatmul.msk.f32.gmra.mxu3 %vm668_vm0, %v461_v41  ;;  %v386_v40 = vld [vmem:[%s1973_s28 + $0x70] sm:$0xff]  ;;  %v442_v48 = vmul.f32 %v410_v39, %v378_v38  ;;  %v435_v60 = vld [vmem:[%s1979_s7 + $0xf8] sm:$0xff]  ;;  %v879_v12 = vld [vmem:[%s2107_s16 + $0x8] sm:$0xff] }
  0x30   : > { %v418_v41 = vld [vmem:[%s1979_s7 + $0x70] sm:$0xff]  ;;  %v881_v8 = vld [vmem:[%s2107_s16 + $0x18] sm:$0xff]  ;;  %v886_v23 = vld [vmem:[%s2107_s16 + $0x40] sm:$0xff] }
  0x31   : > { %v434_v45 = vld [vmem:[%s1979_s7 + $0xf0] sm:$0xff]  ;;  %v507_v11 = vld [vmem:[%s1958_s15 + $0xf8] sm:$0xff]  ;;  %v890_v28 = vld [vmem:[%s2107_s16 + $0x60] sm:$0xff] }
  0x32   : > { %v498_v47 = vld [vmem:[%s1958_s15 + $0xb0] sm:$0xff]  ;;  %v885_v25 = vld [vmem:[%s2107_s16 + $0x38] sm:$0xff]  ;;  %v891_v39 = vld [vmem:[%s2107_s16 + $0x68] sm:$0xff] }
  0x33   : > { %v502_v61 = vld [vmem:[%s1958_s15 + $0xd0] sm:$0xff]  ;;  %v889_v30 = vld [vmem:[%s2107_s16 + $0x58] sm:$0xff] }
  0x34   : > { %565 = vperm.xlu2 %1722, %v487_v50   ;;  %560 = vperm.xlu1 %1721, %v486_v51   ;;  %v450_v50 = vmul.f32 %v418_v41, %v386_v40  ;;  %v458_v51 = vmul.f32 %v426_v43, %v394_v42  ;;  %v880_v9 = vld [vmem:[%s2107_s16 + $0x10] sm:$0xff] }
  0x35   : > { %555 = vperm.xlu0 %1720, %v485_v53   ;;  %1557 = vmatmul.msk.f32.gmra.mxu0 %vm668_vm0, %v438_v52  ;;  %v466_v52 = vmul.f32 %v434_v45, %v402_v44  ;;  %v379_v53 = vld [vmem:[%s1973_s28 + $0x38] sm:$0xff]  ;;  %v506_v13 = vld [vmem:[%s1958_s15 + $0xf0] sm:$0xff] }
  0x36   : > { %1565 = vmatmul.msk.f32.gmra.mxu1 %vm668_vm0, %v446_v54  ;;  %1573 = vmatmul.msk.f32.gmra.mxu2 %vm668_vm0, %v454_v55  ;;  %v411_v54 = vld [vmem:[%s1979_s7 + $0x38] sm:$0xff]  ;;  %v884_v14 = vld [vmem:[%s2107_s16 + $0x30] sm:$0xff] }
  0x37   : > { %1581 = vmatmul.msk.f32.gmra.mxu3 %vm668_vm0, %v462_v56  ;;  %v387_v55 = vld [vmem:[%s1973_s28 + $0x78] sm:$0xff]  ;;  %v443_v63 = vmul.f32 %v411_v54, %v379_v53  ;;  %v896_v44 = vld [vmem:[%s2107_s16 + $0x90] sm:$0xff]  ;;  %v899_v53 = vld [vmem:[%s2107_s16 + $0xa8] sm:$0xff] }
  0x38   : > { %v419_v56 = vld [vmem:[%s1979_s7 + $0x78] sm:$0xff] }
  0x3c   : > { %580 = vperm.xlu2 %1722, %v490_v1   ;;  %575 = vperm.xlu1 %1721, %v489_v2   ;;  %v451_v1 = vmul.f32 %v419_v56, %v387_v55  ;;  %v459_v2 = vmul.f32 %v427_v58, %v395_v57  ;;  %v898_v55 = vld [vmem:[%s2107_s16 + $0xa0] sm:$0xff]  ;;  %v897_v57 = vld [vmem:[%s2107_s16 + $0x98] sm:$0xff] }
  0x3d   : > { %570 = vperm.xlu0 %1720, %v488_v4   ;;  %1558 = vmatmul.msk.f32.gmra.mxu0 %vm668_vm0, %v439_v3  ;;  %v467_v3 = vmul.f32 %v435_v60, %v403_v59  ;;  %v878_v4 = vld [vmem:[%s2107_s16] sm:$0xff] }
  0x3e   : > { %1566 = vmatmul.msk.f32.gmra.mxu1 %vm668_vm0, %v447_v5  ;;  %1574 = vmatmul.msk.f32.gmra.mxu2 %vm668_vm0, %v455_v6  ;;  %v505_v5 = vld [vmem:[%s1958_s15 + $0xe8] sm:$0xff]  ;;  %v504_v6 = vld [vmem:[%s1958_s15 + $0xe0] sm:$0xff]  ;;  %1723 = vrcp.f32 %v878_v4 }
  0x3f   : > { %1582 = vmatmul.msk.f32.gmra.mxu3 %vm668_vm0, %v463_v7  ;;  %v503_v7 = vld [vmem:[%s1958_s15 + $0xd8] sm:$0xff]  ;;  %1725 = vrcp.f32 %v881_v8  ;;  %s1546_s15 = sshll.u32 %s308_s12, 8 }
  0x40   : > { %1727 = vrcp.f32 %v880_v9  ;;  %s2219_s17 = scalar_lea.vmem [#allocation2], %s1546_s15  }
  0x41   : > { %1729 = vrcp.f32 %v879_v12  ;;  %v904_v12 = vld [vmem:[%s2107_s16 + $0xd0] sm:$0xff] }
  0x42   : > { %1731 = vrcp.f32 %v884_v14  ;;  %v903_v14 = vld [vmem:[%s2107_s16 + $0xc8] sm:$0xff] }
  0x44   : > { %595 = vperm.xlu2 %1722, %v493_v16   ;;  %590 = vperm.xlu1 %1721, %v492_v17   ;;  %v1724_v10 = vpop.eup %1723  ;;  %v883_v16 = vld [vmem:[%s2107_s16 + $0x28] sm:$0xff] }
  0x45   : > { %585 = vperm.xlu0 %1720, %v491_v19   ;;  %1559 = vmatmul.msk.f32.gmra.mxu0 %vm668_vm0, %v440_v18  ;;  %v1726_v15 = vpop.eup %1725  ;;  %v882_v18 = vld [vmem:[%s2107_s16 + $0x20] sm:$0xff]  ;;  %1733 = vrcp.f32 %v883_v16 }
  0x46   : > { %1567 = vmatmul.msk.f32.gmra.mxu1 %vm668_vm0, %v448_v20  ;;  %1575 = vmatmul.msk.f32.gmra.mxu2 %vm668_vm0, %v456_v21  ;;  %v1728_v17 = vpop.eup %1727  ;;  %1735 = vrcp.f32 %v882_v18  ;;  %v887_v21 = vld [vmem:[%s2107_s16 + $0x48] sm:$0xff] }
  0x47   : > { %1583 = vmatmul.msk.f32.gmra.mxu3 %vm668_vm0, %v464_v22  ;;  %v1730_v19 = vpop.eup %1729  ;;  %1737 = vrcp.f32 %v887_v21 }
  0x48   : > { %v1732_v22 = vpop.eup %1731  ;;  %1739 = vrcp.f32 %v886_v23 }
  0x49   : > { %1741 = vrcp.f32 %v885_v25 }
  0x4a   : > { %1743 = vrcp.f32 %v890_v28 }
  0x4b   : > { %v1734_v24 = vpop.eup %1733  ;;  %1745 = vrcp.f32 %v889_v30 }
  0x4c   : > { %610 = vperm.xlu2 %1722, %v496_v31   ;;  %605 = vperm.xlu1 %1721, %v495_v32   ;;  %v1736_v26 = vpop.eup %1735  ;;  %v888_v32 = vld [vmem:[%s2107_s16 + $0x50] sm:$0xff] }
  0x4d   : > { %600 = vperm.xlu0 %1720, %v494_v34   ;;  %1560 = vmatmul.msk.f32.gmra.mxu0 %vm668_vm0, %v441_v33  ;;  %v1738_v29 = vpop.eup %1737  ;;  %1747 = vrcp.f32 %v888_v32 }
  0x4e   : > { %1568 = vmatmul.msk.f32.gmra.mxu1 %vm668_vm0, %v449_v35  ;;  %1576 = vmatmul.msk.f32.gmra.mxu2 %vm668_vm0, %v457_v36  ;;  %v1740_v31 = vpop.eup %1739  ;;  %v893_v35 = vld [vmem:[%s2107_s16 + $0x78] sm:$0xff] }
  0x4f   : > { %1584 = vmatmul.msk.f32.gmra.mxu3 %vm668_vm0, %v465_v37  ;;  %v1742_v33 = vpop.eup %1741  ;;  %v892_v37 = vld [vmem:[%s2107_s16 + $0x70] sm:$0xff]  ;;  %1749 = vrcp.f32 %v893_v35 }
  0x50   : > { %v1744_v36 = vpop.eup %1743  ;;  %1751 = vrcp.f32 %v892_v37 }
  0x51   : > { %v1746_v38 = vpop.eup %1745  ;;  %1753 = vrcp.f32 %v891_v39 }
  0x52   : > { %1755 = vrcp.f32 %v896_v44 }
  0x53   : > { %v1748_v40 = vpop.eup %1747 }
  0x54   : > { %625 = vperm.xlu2 %1722, %v499_v46   ;;  %620 = vperm.xlu1 %1721, %v498_v47   ;;  %v895_v46 = vld [vmem:[%s2107_s16 + $0x88] sm:$0xff] }
  0x55   : > { %615 = vperm.xlu0 %1720, %v497_v49   ;;  %1561 = vmatmul.msk.f32.gmra.mxu0 %vm668_vm0, %v442_v48  ;;  %v1750_v45 = vpop.eup %1749  ;;  %v894_v48 = vld [vmem:[%s2107_s16 + $0x80] sm:$0xff]  ;;  %1757 = vrcp.f32 %v895_v46 }
  0x56   : > { %1569 = vmatmul.msk.f32.gmra.mxu1 %vm668_vm0, %v450_v50  ;;  %1577 = vmatmul.msk.f32.gmra.mxu2 %vm668_vm0, %v458_v51  ;;  %v1752_v47 = vpop.eup %1751  ;;  %1759 = vrcp.f32 %v894_v48 }
  0x57   : > { %1585 = vmatmul.msk.f32.gmra.mxu3 %vm668_vm0, %v466_v52  ;;  %v1754_v49 = vpop.eup %1753  ;;  %1761 = vrcp.f32 %v899_v53 }
  0x58   : > { %v1756_v54 = vpop.eup %1755  ;;  %1763 = vrcp.f32 %v898_v55 }
  0x59   : > { %1765 = vrcp.f32 %v897_v57 }
  0x5b   : > { %v1758_v56 = vpop.eup %1757 }
  0x5c   : > { %640 = vperm.xlu2 %1722, %v502_v61   ;;  %635 = vperm.xlu1 %1721, %v501_v62   ;;  %v1760_v58 = vpop.eup %1759  ;;  %v902_v62 = vld [vmem:[%s2107_s16 + $0xc0] sm:$0xff] }
  0x5d   : > { %630 = vperm.xlu0 %1720, %v500_v0   ;;  %1562 = vmatmul.msk.f32.gmra.mxu0 %vm668_vm0, %v443_v63  ;;  %v1762_v63 = vpop.eup %1761  ;;  %v901_v0 = vld [vmem:[%s2107_s16 + $0xb8] sm:$0xff]  ;;  %1767 = vrcp.f32 %v902_v62 }
  0x5e   : > { %1570 = vmatmul.msk.f32.gmra.mxu1 %vm668_vm0, %v451_v1  ;;  %1578 = vmatmul.msk.f32.gmra.mxu2 %vm668_vm0, %v459_v2  ;;  %v1764_v1 = vpop.eup %1763  ;;  %v900_v2 = vld [vmem:[%s2107_s16 + $0xb0] sm:$0xff]  ;;  %1769 = vrcp.f32 %v901_v0 }
  0x5f   : > { %1586 = vmatmul.msk.f32.gmra.mxu3 %vm668_vm0, %v467_v3  ;;  %v1766_v3 = vpop.eup %1765  ;;  %1771 = vrcp.f32 %v900_v2 }
  0x64   : > { %655 = vperm.xlu2 %1722, %v505_v5   ;;  %650 = vperm.xlu1 %1721, %v504_v6  }
  0x65   : > { %645 = vperm.xlu0 %1720, %v503_v7  }
  0x6c   : > { %944 = vperm.xlu2 %1722, %v1724_v10   ;;  %665 = vperm.xlu1 %1721, %v507_v11   ;;  %v905_v10 = vld [vmem:[%s2107_s16 + $0xd8] sm:$0xff]  ;;  %v1768_v11 = vpop.eup %1767 }
  0x6d   : > { %660 = vperm.xlu0 %1720, %v506_v13   ;;  %v1770_v13 = vpop.eup %1769  ;;  %1773 = vrcp.f32 %v905_v10 }
  0x6e   : > { %1775 = vrcp.f32 %v904_v12 }
  0x6f   : > { %1777 = vrcp.f32 %v903_v14 }
  0x74   : > { %959 = vperm.xlu2 %1722, %v1726_v15   ;;  %954 = vperm.xlu1 %1721, %v1728_v17   ;;  %v2125_v20 = vpop.permute.xlu2 %530  ;;  %v1772_v15 = vpop.eup %1771 }
  0x75   : > { %949 = vperm.xlu0 %1720, %v1730_v19   ;;  %v1774_v23 = vpop.eup %1773 }
  0x76   : > { %v1776_v25 = vpop.eup %1775 }
  0x77   : > { %v1778_v28 = vpop.eup %1777 }
  0x7c   : > { %974 = vperm.xlu2 %1722, %v1732_v22   ;;  %969 = vperm.xlu1 %1721, %v1734_v24   ;;  %v908_v22 = vld [vmem:[%s2107_s16 + $0xf0] sm:$0xff]  ;;  %v907_v24 = vld [vmem:[%s2107_s16 + $0xe8] sm:$0xff] }
  0x7d   : > { %964 = vperm.xlu0 %1720, %v1736_v26   ;;  %v906_v26 = vld [vmem:[%s2107_s16 + $0xe0] sm:$0xff]  ;;  %1779 = vrcp.f32 %v908_v22 }
  0x7e   : > { %v2130_v27 = vpop.permute.xlu2 %535  ;;  %1781 = vrcp.f32 %v907_v24 }
  0x7f   : > { %1783 = vrcp.f32 %v906_v26 }
  0x84   : > { %989 = vperm.xlu2 %1722, %v1738_v29   ;;  %984 = vperm.xlu1 %1721, %v1740_v31  }
  0x85   : > { %979 = vperm.xlu0 %1720, %v1742_v33  }
  0x86   : > { %v551_v34 = vpop.permute.xlu2 %550 }
  0x8c   : > { %1004 = vperm.xlu2 %1722, %v1744_v36   ;;  %999 = vperm.xlu1 %1721, %v1746_v38   ;;  %v909_v36 = vld [vmem:[%s2107_s16 + $0xf8] sm:$0xff] }
  0x8d   : > { %994 = vperm.xlu0 %1720, %v1748_v40   ;;  %v2138_v41 = vpop.permute.xlu1 %520  ;;  %v2140_v42 = vpop.permute.xlu0 %510  ;;  %1785 = vrcp.f32 %v909_v36 }
  0x8e   : > { %v2142_v43 = vpop.permute.xlu2 %565 }
  0x94   : > { %1019 = vperm.xlu2 %1722, %v1750_v45   ;;  %1014 = vperm.xlu1 %1721, %v1752_v47  }
  0x95   : > { %1009 = vperm.xlu0 %1720, %v1754_v49  }
  0x96   : > { %v2147_v50 = vpop.permute.xlu2 %580  ;;  %v2149_v51 = vpop.permute.xlu1 %525 }
  0x97   : > { %v2151_v52 = vpop.permute.xlu0 %515 }
  0x9c   : > { %1034 = vperm.xlu2 %1722, %v1756_v54   ;;  %1029 = vperm.xlu1 %1721, %v1758_v56  }
  0x9d   : > { %1024 = vperm.xlu0 %1720, %v1760_v58  }
  0x9e   : > { %v2156_v59 = vpop.permute.xlu2 %595  ;;  %v2158_v60 = vpop.permute.xlu1 %545 }
  0x9f   : > { %v2160_v61 = vpop.permute.xlu0 %540 }
  0xa2   : > { %v2165_v4 = vpop.f32.mrf.mxu0 }
  0xa3   : > { %v806_v5 = vpop.f32.mrf.mxu1  ;;  %v783_v48 = vadd.f32 %v2165_v4, %v2140_v42 }
  0xa4   : > { %v2167_v6 = vadd.f32 %v806_v5, %v551_v34  ;;  %1049 = vperm.xlu2 %1722, %v1762_v63   ;;  %1044 = vperm.xlu1 %1721, %v1764_v1   ;;  %v1780_v34 = vpop.eup %1779 }
  0xa5   : > { %1039 = vperm.xlu0 %1720, %v1766_v3   ;;  %v1782_v35 = vpop.eup %1781 }
  0xa6   : > { %v2169_v7 = vpop.permute.xlu2 %610  ;;  %v2171_v8 = vpop.permute.xlu1 %560 }
  0xa7   : > { %v2173_v9 = vpop.permute.xlu0 %555  ;;  %v1784_v37 = vpop.eup %1783 }
  0xa8   : > { %v1786_v46 = vpop.eup %1785 }
  0xa9   : > { %v2215_v54 = vpop.f32.mrf.mxu2 }
  0xaa   : > { %v2178_v16 = vpop.f32.mrf.mxu0 }
  0xab   : > { %v2180_v17 = vpop.f32.mrf.mxu1 }
  0xac   : > { %1064 = vperm.xlu2 %1722, %v1768_v11   ;;  %1059 = vperm.xlu1 %1721, %v1770_v13  }
  0xad   : > { %1054 = vperm.xlu0 %1720, %v1772_v15   ;;  %v810_v15 = vadd.f32 %v2180_v17, %v2173_v9  ;;  %v786_v17 = vadd.f32 %v2178_v16, %v2151_v52 }
  0xae   : > { %v2182_v18 = vpop.permute.xlu2 %625  ;;  %v2184_v19 = vpop.permute.xlu1 %575 }
  0xaf   : > { %v2186_v21 = vpop.permute.xlu0 %570 }
  0xb1   : > { %v2228_v2 = vpop.f32.mrf.mxu2 }
  0xb2   : > { %v2191_v29 = vpop.f32.mrf.mxu0 }
  0xb3   : > { %v2197_v32 = vpop.f32.mrf.mxu1 }
  0xb4   : > { %1079 = vperm.xlu2 %1722, %v1774_v23   ;;  %1074 = vperm.xlu1 %1721, %v1776_v25  }
  0xb5   : > { %1069 = vperm.xlu0 %1720, %v1778_v28   ;;  %v789_v28 = vadd.f32 %v2191_v29, %v2138_v41 }
  0xb6   : > { %v2193_v30 = vpop.permute.xlu2 %640  ;;  %v2195_v31 = vpop.permute.xlu1 %590 }
  0xb7   : > { %v2199_v33 = vpop.permute.xlu0 %585 }
  0xb9   : > { %v836_v14 = vpop.f32.mrf.mxu2 }
  0xba   : > { %v791_v38 = vpop.f32.mrf.mxu0 }
  0xbb   : > { %v2209_v45 = vpop.f32.mrf.mxu1  ;;  %v792_v42 = vadd.f32 %v791_v38, %v2149_v51  ;;  %v2237_v51 = vpop.f32.mrf.mxu3 }
  0xbc   : > { %1094 = vperm.xlu2 %1722, %v1780_v34   ;;  %1089 = vperm.xlu1 %1721, %v1782_v35  }
  0xbd   : > { %1084 = vperm.xlu0 %1720, %v1784_v37  }
  0xbe   : > { %v2202_v39 = vpop.permute.xlu2 %655  ;;  %v2204_v40 = vpop.permute.xlu1 %605 }
  0xbf   : > { %v2206_v44 = vpop.permute.xlu0 %600 }
  0xc1   : > { %v2255_v34 = vpop.f32.mrf.mxu2 }
  0xc2   : > { %v794_v47 = vpop.f32.mrf.mxu0 }
  0xc3   : > { %v818_v58 = vpop.f32.mrf.mxu1  ;;  %v2249_v26 = vpop.f32.mrf.mxu3 }
  0xc4   : > { %v819_v9 = vadd.f32 %v818_v58, %v2186_v21  ;;  %v795_v21 = vadd.f32 %v794_v47, %v2125_v20 }
  0xc5   : > { %1099 = vperm.xlu0 %1720, %v1786_v46  }
  0xc6   : > { %v945_v49 = vpop.permute.xlu2 %944  ;;  %v2213_v53 = vpop.permute.xlu1 %620 }
  0xc7   : > { %v1102_v55 = vmul.f32 %v945_v49, %v783_v48  ;;  %v2217_v56 = vpop.permute.xlu0 %615 }
  0xc9   : > { %1134 = vst.msk [vmem:[%s2219_s17] sm:$0xff] %vm668_vm0, %v1102_v55 }
  0xca   : > { %v797_v57 = vpop.f32.mrf.mxu0 }
  0xcb   : > { %v2232_v4 = vpop.f32.mrf.mxu1  ;;  %v2264_v41 = vpop.f32.mrf.mxu3  ;;  %v798_v52 = vadd.f32 %v797_v57, %v2130_v27  ;;  %v837_v27 = vadd.f32 %v836_v14, %v2206_v44 }
  0xce   : > { %v960_v62 = vpop.permute.xlu2 %959  ;;  %v2224_v63 = vpop.permute.xlu1 %635 }
  0xcf   : > { %v1105_v0 = vmul.f32 %v960_v62, %v792_v42  ;;  %v2226_v1 = vpop.permute.xlu0 %630 }
  0xd1   : > { %1137 = vst.msk [vmem:[%s2219_s17 + $0x18] sm:$0xff] %vm668_vm0, %v1105_v0  ;;  %v842_v0 = vpop.f32.mrf.mxu2 }
  0xd2   : > { %v800_v3 = vpop.f32.mrf.mxu0 }
  0xd3   : > { %v801_v5 = vadd.f32 %v800_v3, %v2160_v61  ;;  %v824_v25 = vpop.f32.mrf.mxu1  ;;  %v863_v20 = vpop.f32.mrf.mxu3 }
  0xd6   : > { %v975_v10 = vpop.permute.xlu2 %974  ;;  %v2235_v11 = vpop.permute.xlu1 %650 }
  0xd7   : > { %v1108_v12 = vmul.f32 %v975_v10, %v801_v5  ;;  %v2239_v13 = vpop.permute.xlu0 %645 }
  0xd9   : > { %1140 = vst.msk [vmem:[%s2219_s17 + $0x30] sm:$0xff] %vm668_vm0, %v1108_v12 }
  0xda   : > { %v803_v5 = vpop.f32.mrf.mxu0 }
  0xdb   : > { %v827_v49 = vpop.f32.mrf.mxu1 }
  0xdc   : > { %v828_v16 = vadd.f32 %v827_v49, %v2199_v33  ;;  %v804_v33 = vadd.f32 %v803_v5, %v2158_v60  ;;  %v816_v60 = vadd.f32 %v2209_v45, %v2142_v43  ;;  %v855_v43 = vadd.f32 %v2237_v51, %v2226_v1 }
  0xdd   : > { %v831_v1 = vadd.f32 %v2215_v54, %v2195_v31  ;;  %v840_v54 = vadd.f32 %v2255_v34, %v2204_v40 }
  0xde   : > { %v990_v22 = vpop.permute.xlu2 %989  ;;  %v2245_v23 = vpop.permute.xlu1 %665 }
  0xdf   : > { %v1111_v24 = vmul.f32 %v990_v22, %v810_v15  ;;  %v2247_v61 = vpop.permute.xlu0 %660 }
  0xe1   : > { %1143 = vst.msk [vmem:[%s2219_s17 + $0x48] sm:$0xff] %vm668_vm0, %v1111_v24  ;;  %v845_v24 = vpop.f32.mrf.mxu2 }
  0xe2   : > { %v846_v44 = vadd.f32 %v845_v24, %v2217_v56 }
  0xe6   : > { %v1005_v35 = vpop.permute.xlu2 %1004  ;;  %v955_v36 = vpop.permute.xlu1 %954 }
  0xe7   : > { %v1114_v37 = vmul.f32 %v1005_v35, %v819_v9  ;;  %v1104_v38 = vmul.f32 %v955_v36, %v789_v28  ;;  %v950_v46 = vpop.permute.xlu0 %949  ;;  %v866_v36 = vpop.f32.mrf.mxu3 }
  0xe8   : > { %v1103_v48 = vmul.f32 %v950_v46, %v786_v17 }
  0xe9   : > { %1146 = vst.msk [vmem:[%s2219_s17 + $0x60] sm:$0xff] %vm668_vm0, %v1114_v37 }
  0xea   : > { %1136 = vst.msk [vmem:[%s2219_s17 + $0x10] sm:$0xff] %vm668_vm0, %v1104_v38 }
  0xeb   : > { %1135 = vst.msk [vmem:[%s2219_s17 + $0x8] sm:$0xff] %vm668_vm0, %v1103_v48 }
  0xee   : > { %v1020_v29 = vpop.permute.xlu2 %1019  ;;  %v970_v55 = vpop.permute.xlu1 %969 }
  0xef   : > { %v1117_v58 = vmul.f32 %v1020_v29, %v828_v16  ;;  %v1107_v42 = vmul.f32 %v970_v55, %v798_v52  ;;  %v965_v62 = vpop.permute.xlu0 %964  ;;  %v869_v52 = vpop.f32.mrf.mxu3 }
  0xf0   : > { %v1106_v3 = vmul.f32 %v965_v62, %v795_v21  ;;  %v848_v29 = vpop.f32.mrf.mxu2 }
  0xf1   : > { %1149 = vst.msk [vmem:[%s2219_s17 + $0x78] sm:$0xff] %vm668_vm0, %v1117_v58  ;;  %v849_v40 = vadd.f32 %v848_v29, %v2213_v53 }
  0xf2   : > { %1139 = vst.msk [vmem:[%s2219_s17 + $0x28] sm:$0xff] %vm668_vm0, %v1107_v42 }
  0xf3   : > { %1138 = vst.msk [vmem:[%s2219_s17 + $0x20] sm:$0xff] %vm668_vm0, %v1106_v3 }
  0xf6   : > { %v1035_v47 = vpop.permute.xlu2 %1034  ;;  %v985_v57 = vpop.permute.xlu1 %984 }
  0xf7   : > { %v1120_v10 = vmul.f32 %v1035_v47, %v837_v27  ;;  %v1110_v12 = vmul.f32 %v985_v57, %v2167_v6  ;;  %v980_v15 = vpop.permute.xlu0 %979  ;;  %v813_v6 = vadd.f32 %v2197_v32, %v2171_v8  ;;  %v825_v8 = vadd.f32 %v824_v25, %v2147_v50 }
  0xf8   : > { %v1109_v22 = vmul.f32 %v980_v15, %v804_v33  ;;  %v822_v32 = vadd.f32 %v2232_v4, %v2184_v19  ;;  %v834_v50 = vadd.f32 %v2228_v2, %v2156_v59  ;;  %v864_v19 = vadd.f32 %v863_v20, %v2239_v13  ;;  %v872_v59 = vpop.f32.mrf.mxu3  ;;  %v851_v27 = vpop.f32.mrf.mxu2 }
  0xf9   : > { %1152 = vst.msk [vmem:[%s2219_s17 + $0x90] sm:$0xff] %vm668_vm0, %v1120_v10  ;;  %v843_v2 = vadd.f32 %v842_v0, %v2169_v7  ;;  %v873_v31 = vadd.f32 %v872_v59, %v2247_v61  ;;  %v852_v7 = vadd.f32 %v851_v27, %v2182_v18  ;;  %v861_v33 = vadd.f32 %v2264_v41, %v2193_v30 }
  0xfa   : > { %1142 = vst.msk [vmem:[%s2219_s17 + $0x40] sm:$0xff] %vm668_vm0, %v1110_v12  ;;  %v858_v47 = vadd.f32 %v2249_v26, %v2224_v63  ;;  %v870_v12 = vadd.f32 %v869_v52, %v2202_v39  ;;  %v867_v15 = vadd.f32 %v866_v36, %v2235_v11 }
  0xfb   : > { %1141 = vst.msk [vmem:[%s2219_s17 + $0x38] sm:$0xff] %vm668_vm0, %v1109_v22 }
  0xfe   : > { %v1050_v14 = vpop.permute.xlu2 %1049  ;;  %v1000_v28 = vpop.permute.xlu1 %999 }
  0xff   : > { %v1123_v9 = vmul.f32 %v1050_v14, %v846_v44  ;;  %v1113_v17 = vmul.f32 %v1000_v28, %v816_v60  ;;  %v995_v35 = vpop.permute.xlu0 %994 }
 0x100   : > { %v1112_v37 = vmul.f32 %v995_v35, %v813_v6  ;;  %v875_v63 = vpop.f32.mrf.mxu3 }
 0x101   : > { %1155 = vst.msk [vmem:[%s2219_s17 + $0xa8] sm:$0xff] %vm668_vm0, %v1123_v9  ;;  %v876_v26 = vadd.f32 %v875_v63, %v2245_v23 }
 0x102   : > { %1145 = vst.msk [vmem:[%s2219_s17 + $0x58] sm:$0xff] %vm668_vm0, %v1113_v17 }
 0x103   : > { %1144 = vst.msk [vmem:[%s2219_s17 + $0x50] sm:$0xff] %vm668_vm0, %v1112_v37 }
 0x106   : > { %v1065_v45 = vpop.permute.xlu2 %1064  ;;  %v1015_v56 = vpop.permute.xlu1 %1014 }
 0x107   : > { %v1126_v38 = vmul.f32 %v1065_v45, %v855_v43  ;;  %v1116_v46 = vmul.f32 %v1015_v56, %v825_v8  ;;  %v1010_v48 = vpop.permute.xlu0 %1009 }
 0x108   : > { %v1115_v49 = vmul.f32 %v1010_v48, %v822_v32 }
 0x109   : > { %1158 = vst.msk [vmem:[%s2219_s17 + $0xc0] sm:$0xff] %vm668_vm0, %v1126_v38 }
 0x10a   : > { %1148 = vst.msk [vmem:[%s2219_s17 + $0x70] sm:$0xff] %vm668_vm0, %v1116_v46 }
 0x10b   : > { %1147 = vst.msk [vmem:[%s2219_s17 + $0x68] sm:$0xff] %vm668_vm0, %v1115_v49 }
 0x10e   : > { %v1080_v4 = vpop.permute.xlu2 %1079  ;;  %v1030_v51 = vpop.permute.xlu1 %1029 }
 0x10f   : > { %v1129_v25 = vmul.f32 %v1080_v4, %v864_v19  ;;  %v1119_v16 = vmul.f32 %v1030_v51, %v834_v50  ;;  %v1025_v21 = vpop.permute.xlu0 %1024 }
 0x110   : > { %v1118_v55 = vmul.f32 %v1025_v21, %v831_v1 }
 0x111   : > { %1161 = vst.msk [vmem:[%s2219_s17 + $0xd8] sm:$0xff] %vm668_vm0, %v1129_v25 }
 0x112   : > { %1151 = vst.msk [vmem:[%s2219_s17 + $0x88] sm:$0xff] %vm668_vm0, %v1119_v16 }
 0x113   : > { %1150 = vst.msk [vmem:[%s2219_s17 + $0x80] sm:$0xff] %vm668_vm0, %v1118_v55 }
 0x116   : > { %v1095_v13 = vpop.permute.xlu2 %1094  ;;  %v1045_v58 = vpop.permute.xlu1 %1044 }
 0x117   : > { %v1132_v42 = vmul.f32 %v1095_v13, %v873_v31  ;;  %v1122_v62 = vmul.f32 %v1045_v58, %v843_v2  ;;  %v1040_v3 = vpop.permute.xlu0 %1039 }
 0x118   : > { %v1121_v5 = vmul.f32 %v1040_v3, %v840_v54 }
 0x119   : > { %1164 = vst.msk [vmem:[%s2219_s17 + $0xf0] sm:$0xff] %vm668_vm0, %v1132_v42 }
 0x11a   : > { %1154 = vst.msk [vmem:[%s2219_s17 + $0xa0] sm:$0xff] %vm668_vm0, %v1122_v62 }
 0x11b   : > { %1153 = vst.msk [vmem:[%s2219_s17 + $0x98] sm:$0xff] %vm668_vm0, %v1121_v5 }
 0x11e   : > { %v1060_v61 = vpop.permute.xlu1 %1059 }
 0x11f   : > { %v1125_v34 = vmul.f32 %v1060_v61, %v852_v7  ;;  %v1055_v0 = vpop.permute.xlu0 %1054 }
 0x120   : > { %v1124_v20 = vmul.f32 %v1055_v0, %v849_v40 }
 0x121   : > { %1157 = vst.msk [vmem:[%s2219_s17 + $0xb8] sm:$0xff] %vm668_vm0, %v1125_v34 }
 0x122   : > { %1156 = vst.msk [vmem:[%s2219_s17 + $0xb0] sm:$0xff] %vm668_vm0, %v1124_v20 }
 0x126   : > { %v1075_v57 = vpop.permute.xlu1 %1074 }
 0x127   : > { %v1128_v18 = vmul.f32 %v1075_v57, %v861_v33  ;;  %v1070_v10 = vpop.permute.xlu0 %1069 }
 0x128   : > { %v1127_v53 = vmul.f32 %v1070_v10, %v858_v47 }
 0x129   : > { %1160 = vst.msk [vmem:[%s2219_s17 + $0xd0] sm:$0xff] %vm668_vm0, %v1128_v18 }
 0x12a   : > { %1159 = vst.msk [vmem:[%s2219_s17 + $0xc8] sm:$0xff] %vm668_vm0, %v1127_v53 }
 0x12e   : > { %v1090_v22 = vpop.permute.xlu1 %1089 }
 0x12f   : > { %v1131_v24 = vmul.f32 %v1090_v22, %v870_v12  ;;  %v1085_v60 = vpop.permute.xlu0 %1084 }
 0x130   : > { %v1130_v30 = vmul.f32 %v1085_v60, %v867_v15 }
 0x131   : > { %1163 = vst.msk [vmem:[%s2219_s17 + $0xe8] sm:$0xff] %vm668_vm0, %v1131_v24 }
 0x132   : > { %1162 = vst.msk [vmem:[%s2219_s17 + $0xe0] sm:$0xff] %vm668_vm0, %v1130_v30 }
 0x136   : > { %1172 = sbr.rel (!%p1931_p4) target bundleno = 379 (0x17b), region = 44 }
 0x137   : > { %v1100_v41 = vpop.permute.xlu0 %1099 }
 0x138   : > { %v1133_v44 = vmul.f32 %v1100_v41, %v876_v26 }
 0x13a   : > { %1165 = vst.msk [vmem:[%s2219_s17 + $0xf8] sm:$0xff] %vm668_vm0, %v1133_v44 }
 0x13b   : > { %s2510_s18 = smov (!%p1175_p8, %s1174_s18), 32 }
 0x13c   : > { %s1589_s28 = sshll.u32 %s2510_s18, 3 }
 0x13d   : > { %p1592_p9 = scmp.eq.s32.totalorder %s1589_s28, 0 }
 0x13e   : > { %s2365_s29 = sshrl.u32 (!%p1592_p9), %s2510_s18, 5 }
 0x13f   : > { %1183 = sbr.rel (%p1592_p9) target bundleno = 379 (0x17b), region = 48  ;;  %p1593_p10 = scmp.le.s32.totalorder (!%p1592_p9), %s2365_s29, 0 }
 0x144   : > { %1480 = sbr.rel (%p1593_p10) target bundleno = 362 (0x16a), region = 133  ;;  %s2501_s21 = smov (!%p1593_p10), %s2359_s27 }
 0x145   : > { %s2502_s26 = smov (!%p1593_p10), %s2219_s17  ;;  %s2374_s6 = smov (!%p1593_p10), 0  }
 0x146   : > { %s2376_s30 = smov (!%p1593_p10), 0  }
 0x149 LB: >> { %v1308_v39 = vld [vmem:[%s1849_s26] sm:$0xff]  ;;  %v1310_v11 = vld [vmem:[%s1849_s26 + $0x8] sm:$0xff]  ;;  %v1312_v23 = vld [vmem:[%s1849_s26 + $0x10] sm:$0xff]  ;;  %s1372_s7 = sadd.s32 1, %s1853_s6  ;;  %s1302_s30 = sadd.s32 1, %s1857_s30   ;;  %s1857_s30 = sphi %s2376_s30, %s1302_s30   ;;  %s1853_s6 = sphi %s2374_s6, %s2505_s6   ;;  %s1849_s26 = sphi %s2502_s26, %s2504_s26   ;;  %s1845_s21 = sphi %s2501_s21, %s2503_s21  }
 0x14a   : >> { %1309 = vst [vmem:[%s1845_s21] sm:$0xff] %v1308_v39  ;;  %v1314_v6 = vld [vmem:[%s1849_s26 + $0x18] sm:$0xff]  ;;  %p1373_p11 = scmp.ge.s32.totalorder %s1372_s7, %s2365_s29  ;;  %v1316_v14 = vld [vmem:[%s1849_s26 + $0x20] sm:$0xff]  ;;  %v1318_v28 = vld [vmem:[%s1849_s26 + $0x28] sm:$0xff]  ;;  %p1301_p12 = scmp.ge.s32.totalorder %s1302_s30, %s2365_s29 }
 0x14b   : >> { %1311 = vst [vmem:[%s1845_s21 + $0x8] sm:$0xff] %v1310_v11  ;;  %v1320_v9 = vld [vmem:[%s1849_s26 + $0x30] sm:$0xff]  ;;  %v1322_v17 = vld [vmem:[%s1849_s26 + $0x38] sm:$0xff]  ;;  %v1324_v35 = vld [vmem:[%s1849_s26 + $0x40] sm:$0xff] }
 0x14c   : >> { %1313 = vst [vmem:[%s1845_s21 + $0x10] sm:$0xff] %v1312_v23  ;;  %s2512_s7 = smov (%p1373_p11, %s1372_s7), 0  ;;  %v1326_v36 = vld [vmem:[%s1849_s26 + $0x48] sm:$0xff]  ;;  %v1328_v37 = vld [vmem:[%s1849_s26 + $0x50] sm:$0xff]  ;;  %v1330_v43 = vld [vmem:[%s1849_s26 + $0x58] sm:$0xff] }
 0x14d   : >> { %1315 = vst [vmem:[%s1845_s21 + $0x18] sm:$0xff] %v1314_v6  ;;  %s1594_s8 = sshll.u32 %s2512_s7, 8  ;;  %v1332_v8 = vld [vmem:[%s1849_s26 + $0x60] sm:$0xff]  ;;  %v1334_v32 = vld [vmem:[%s1849_s26 + $0x68] sm:$0xff]  ;;  %v1336_v45 = vld [vmem:[%s1849_s26 + $0x70] sm:$0xff]  ;;  %s2505_s6 = smov %s2512_s7 }
 0x14e   : >> { %1317 = vst [vmem:[%s1845_s21 + $0x20] sm:$0xff] %v1316_v14  ;;  %s2408_s9 = scalar_lea.vmem %s2219_s17, %s1594_s8 [#allocation2]   ;;  %s2411_s10 = scalar_lea.vmem %s2359_s27, %s1594_s8   ;;  %v1338_v56 = vld [vmem:[%s1849_s26 + $0x78] sm:$0xff]  ;;  %v1340_v38 = vld [vmem:[%s1849_s26 + $0x80] sm:$0xff]  ;;  %v1342_v46 = vld [vmem:[%s1849_s26 + $0x88] sm:$0xff] }
 0x14f   : >> { %1319 = vst [vmem:[%s1845_s21 + $0x28] sm:$0xff] %v1318_v28  ;;  %v1344_v48 = vld [vmem:[%s1849_s26 + $0x90] sm:$0xff]  ;;  %v1346_v49 = vld [vmem:[%s1849_s26 + $0x98] sm:$0xff]  ;;  %v1348_v52 = vld [vmem:[%s1849_s26 + $0xa0] sm:$0xff] }
 0x150   : >> { %1321 = vst [vmem:[%s1845_s21 + $0x30] sm:$0xff] %v1320_v9  ;;  %v1350_v50 = vld [vmem:[%s1849_s26 + $0xa8] sm:$0xff]  ;;  %v1352_v19 = vld [vmem:[%s1849_s26 + $0xb0] sm:$0xff]  ;;  %v1354_v1 = vld [vmem:[%s1849_s26 + $0xb8] sm:$0xff] }
 0x151   : >> { %1323 = vst [vmem:[%s1845_s21 + $0x38] sm:$0xff] %v1322_v17  ;;  %v1356_v4 = vld [vmem:[%s1849_s26 + $0xc0] sm:$0xff]  ;;  %v1358_v51 = vld [vmem:[%s1849_s26 + $0xc8] sm:$0xff]  ;;  %v1360_v25 = vld [vmem:[%s1849_s26 + $0xd0] sm:$0xff] }
 0x152   : >> { %1325 = vst [vmem:[%s1845_s21 + $0x40] sm:$0xff] %v1324_v35  ;;  %v1362_v16 = vld [vmem:[%s1849_s26 + $0xd8] sm:$0xff]  ;;  %v1364_v21 = vld [vmem:[%s1849_s26 + $0xe0] sm:$0xff]  ;;  %v1366_v29 = vld [vmem:[%s1849_s26 + $0xe8] sm:$0xff] }
 0x153   : >> { %1327 = vst [vmem:[%s1845_s21 + $0x48] sm:$0xff] %v1326_v36  ;;  %v1368_v55 = vld [vmem:[%s1849_s26 + $0xf0] sm:$0xff]  ;;  %v1370_v59 = vld [vmem:[%s1849_s26 + $0xf8] sm:$0xff]  ;;  %s2504_s26 = smov %s2408_s9 }
 0x154   : >> { %1329 = vst [vmem:[%s1845_s21 + $0x50] sm:$0xff] %v1328_v37 }
 0x155   : >> { %1331 = vst [vmem:[%s1845_s21 + $0x58] sm:$0xff] %v1330_v43 }
 0x156   : >> { %1333 = vst [vmem:[%s1845_s21 + $0x60] sm:$0xff] %v1332_v8 }
 0x157   : >> { %1335 = vst [vmem:[%s1845_s21 + $0x68] sm:$0xff] %v1334_v32 }
 0x158   : >> { %1337 = vst [vmem:[%s1845_s21 + $0x70] sm:$0xff] %v1336_v45 }
 0x159   : >> { %1339 = vst [vmem:[%s1845_s21 + $0x78] sm:$0xff] %v1338_v56 }
 0x15a   : >> { %1341 = vst [vmem:[%s1845_s21 + $0x80] sm:$0xff] %v1340_v38 }
 0x15b   : >> { %1343 = vst [vmem:[%s1845_s21 + $0x88] sm:$0xff] %v1342_v46 }
 0x15c   : >> { %1345 = vst [vmem:[%s1845_s21 + $0x90] sm:$0xff] %v1344_v48 }
 0x15d   : >> { %1347 = vst [vmem:[%s1845_s21 + $0x98] sm:$0xff] %v1346_v49 }
 0x15e   : >> { %1349 = vst [vmem:[%s1845_s21 + $0xa0] sm:$0xff] %v1348_v52 }
 0x15f   : >> { %1351 = vst [vmem:[%s1845_s21 + $0xa8] sm:$0xff] %v1350_v50 }
 0x160   : >> { %1353 = vst [vmem:[%s1845_s21 + $0xb0] sm:$0xff] %v1352_v19 }
 0x161   : >> { %1355 = vst [vmem:[%s1845_s21 + $0xb8] sm:$0xff] %v1354_v1 }
 0x162   : >> { %1357 = vst [vmem:[%s1845_s21 + $0xc0] sm:$0xff] %v1356_v4 }
 0x163   : >> { %1359 = vst [vmem:[%s1845_s21 + $0xc8] sm:$0xff] %v1358_v51 }
 0x164   : >> { %1361 = vst [vmem:[%s1845_s21 + $0xd0] sm:$0xff] %v1360_v25 }
 0x165   : >> { %1363 = vst [vmem:[%s1845_s21 + $0xd8] sm:$0xff] %v1362_v16  ;;  %1304 = sbr.rel (!%p1301_p12) target bundleno = 329 (0x149), region = 139 }
 0x166   : >> { %1365 = vst [vmem:[%s1845_s21 + $0xe0] sm:$0xff] %v1364_v21 }
 0x167   : >> { %1367 = vst [vmem:[%s1845_s21 + $0xe8] sm:$0xff] %v1366_v29 }
 0x168   : >> { %1369 = vst [vmem:[%s1845_s21 + $0xf0] sm:$0xff] %v1368_v55 }
 0x169   : >> { %1371 = vst [vmem:[%s1845_s21 + $0xf8] sm:$0xff] %v1370_v59  ;;  %s2503_s21 = smov %s2411_s10 }
 0x16a PF: > { %s2476_s11 = sand.u32 31, %s2510_s18   ;;  %s1605_s13 = sshll.u32 %s2365_s29, 8 }
 0x16b   : > { %s1383_s14 = scalar_lea.vmem %s2219_s17, %s1605_s13 [#allocation2]   ;;  %s1385_s16 = scalar_lea.vmem %s2359_s27, %s1605_s13  }
 0x16c   : > { %p1599_p13 = scmp.le.s32.totalorder %s2476_s11, 0 }
 0x16d   : > { %s1859_s12 = smov (!%p1599_p13), %s1385_s16   ;;  %s1863_s15 = smov (!%p1599_p13), %s1383_s14  }
 0x16e   : > { %1494 = sbr.rel (%p1599_p13) target bundleno = 379 (0x17b), region = 144  ;;  %s1867_s20 = smov (!%p1599_p13), 0  }
 0x16f   : > { %s1871_s23 = smov (!%p1599_p13), 0  }
 0x173 LB: >> { %v1395_v2 = vld [vmem:[%s1865_s15] sm:$0xff]  ;;  %s1397_s18 = sadd.s32 1, %s1869_s20  ;;  %s1389_s23 = sadd.s32 1, %s1873_s23   ;;  %s1873_s23 = sphi %s1871_s23, %s1389_s23   ;;  %s1869_s20 = sphi %s1867_s20, %s1868_s20   ;;  %s1865_s15 = sphi %s1863_s15, %s1402_s15   ;;  %s1861_s12 = sphi %s1859_s12, %s1403_s12  }
 0x174   : >> { %1396 = vst [vmem:[%s1861_s12] sm:$0xff] %v1395_v2  ;;  %p1398_p0 = scmp.ge.s32.totalorder %s1397_s18, %s2476_s11  ;;  %p1388_p1 = scmp.ge.s32.totalorder %s1389_s23, %s2476_s11 }
 0x176   : >> { %s2514_s18 = smov (%p1398_p0, %s1397_s18), 0  ;;  %1391 = sbr.rel (!%p1388_p1) target bundleno = 371 (0x173), region = 150 }
 0x177   : >> { %s1600_s17 = sshll.u32 %s2514_s18, 3  ;;  %s1868_s20 = smov %s2514_s18  }
 0x178   : >> { %s1402_s15 = scalar_lea.vmem %s1383_s14, %s1600_s17 [#allocation2]   ;;  %s1403_s12 = scalar_lea.vmem %s1385_s16, %s1600_s17  }
 0x17b PF: > { %p12_p2 = scmp.ge.s32.totalorder %s1921_s22, 5   ;;  %s2506_s18 = smov %s1837_s19 }
 0x17c   : > { %s2507_s19 = smov %s1929_s25  ;;  %s2508_s20 = smov %s1921_s22 }
 0x17d   :  { %14 = sbr.rel (!%p12_p2) target bundleno = 2 (0x2), region = 161 }

// kernel: tree_attention_forward.3
= control target key start
LH: loop header
LB: loop body
LE: loop exit
PB: predicated region body
PF: predicated region fallthrough
CT: control target
= control target key end

     0   :  { %s1520_s18 = smov 0   ;;  %s2389_s0 = inlined_call_operand.vmem [shape: f32[640,64], index: 0, kind: input, shape index: {}]   ;;  %s2390_s1 = inlined_call_operand.vmem [shape: f32[640,16], index: 1, kind: input, shape index: {}]   ;;  %s2391_s2 = inlined_call_operand.vmem [shape: f32[640,64], index: 2, kind: input, shape index: {}]   ;;  %s2392_s3 = inlined_call_operand.vmem [shape: s32[1,640], index: 3, kind: input, shape index: {}]   ;;  %s2393_s4 = inlined_call_operand.vmem [shape: f32[16,64], index: 4, kind: input, shape index: {}]   ;;  %s2394_s5 = inlined_call_operand.vmem [shape: f32[160,64], index: 5, kind: output, shape index: {}]  }
   0x1 LB: > { %s1526_s19 = sadd.s32 4294967295, %s1486_s18   ;;  %p1280_p0 = scmp.ge.s32.totalorder %s1486_s18, 1  ;;  %s1486_s18 = sphi %s1520_s18, %s15_s18  }
   0x2   : > { %p245_p1 = scmp.lt.s32.totalorder %s1486_s18, 4 }
   0x4   : > { %p246_p2 = pnand %p1280_p0, %p245_p1 }
   0x6   : > { %249 = sbr.rel (%p246_p2) target bundleno = 601 (0x259), region = 40 }
   0xb   : > { %s1281_s20 = sshll.u32 %s1526_s19, 5  ;;  %s1287_s21 = sshll.u32 %s1526_s19, 1 }
   0xc   : > { %p302_p3 = scmp.lt.s32.totalorder %s1281_s20, 79  ;;  %p343_p4 = scmp.lt.s32.totalorder %s1287_s21, 4 }
   0xd   : > { %p1288_p5 = scmp.ne.s32.totalorder %s1526_s19, 0 }
   0xe   : > { %s2416_s20 = smov (!%p302_p3, %s1281_s20), 79  ;;  %s2418_s21 = smov (!%p343_p4, %s1287_s21), 4 }
   0xf   : > { %s1282_s22 = sshll.u32 %s2416_s20, 3  ;;  %s345_s9 = scalar_lea.vmem %s2392_s3, %s2418_s21 }
  0x10   : > { %s1537_s25 = scalar_lea.vmem %s2389_s0, %s1282_s22  ;;  %s1542_s28 = scalar_lea.vmem %s2390_s1, %s1282_s22 }
  0x11   : > { %s1547_s6 = scalar_lea.vmem %s2391_s2, %s1282_s22  ;;  %353 = sbr.rel (%p1288_p5) target bundleno = 43 (0x2b), region = 44 }
  0x16   : > { %vm354_vm0 = vcmask 523264   ;;  %v1488_v0 = vmov 0.0  }
  0x17   : > { %355 = vst.msk [vmem:[%s2394_s5] sm:$0xff] %vm354_vm0, %v1488_v0 }
  0x18   : > { %356 = vst.msk [vmem:[%s2394_s5 + $0x8] sm:$0xff] %vm354_vm0, %v1488_v0 }
  0x19   : > { %357 = vst.msk [vmem:[%s2394_s5 + $0x10] sm:$0xff] %vm354_vm0, %v1488_v0 }
  0x1a   : > { %358 = vst.msk [vmem:[%s2394_s5 + $0x18] sm:$0xff] %vm354_vm0, %v1488_v0 }
  0x1b   : > { %359 = vst.msk [vmem:[%s2394_s5 + $0x20] sm:$0xff] %vm354_vm0, %v1488_v0 }
  0x1c   : > { %360 = vst.msk [vmem:[%s2394_s5 + $0x28] sm:$0xff] %vm354_vm0, %v1488_v0 }
  0x1d   : > { %361 = vst.msk [vmem:[%s2394_s5 + $0x30] sm:$0xff] %vm354_vm0, %v1488_v0 }
  0x1e   : > { %362 = vst.msk [vmem:[%s2394_s5 + $0x38] sm:$0xff] %vm354_vm0, %v1488_v0 }
  0x1f   : > { %363 = vst.msk [vmem:[%s2394_s5 + $0x40] sm:$0xff] %vm354_vm0, %v1488_v0 }
  0x20   : > { %364 = vst.msk [vmem:[%s2394_s5 + $0x48] sm:$0xff] %vm354_vm0, %v1488_v0 }
  0x21   : > { %365 = vst.msk [vmem:[%s2394_s5 + $0x50] sm:$0xff] %vm354_vm0, %v1488_v0 }
  0x22   : > { %366 = vst.msk [vmem:[%s2394_s5 + $0x58] sm:$0xff] %vm354_vm0, %v1488_v0 }
  0x23   : > { %367 = vst.msk [vmem:[%s2394_s5 + $0x60] sm:$0xff] %vm354_vm0, %v1488_v0 }
  0x24   : > { %368 = vst.msk [vmem:[%s2394_s5 + $0x68] sm:$0xff] %vm354_vm0, %v1488_v0 }
  0x25   : > { %369 = vst.msk [vmem:[%s2394_s5 + $0x70] sm:$0xff] %vm354_vm0, %v1488_v0 }
  0x26   : > { %370 = vst.msk [vmem:[%s2394_s5 + $0x78] sm:$0xff] %vm354_vm0, %v1488_v0 }
  0x27   : > { %371 = vst.msk [vmem:[%s2394_s5 + $0x80] sm:$0xff] %vm354_vm0, %v1488_v0 }
  0x28   : > { %372 = vst.msk [vmem:[%s2394_s5 + $0x88] sm:$0xff] %vm354_vm0, %v1488_v0 }
  0x29   : > { %373 = vst.msk [vmem:[%s2394_s5 + $0x90] sm:$0xff] %vm354_vm0, %v1488_v0 }
  0x2a   : > { %374 = vst.msk [vmem:[%s2394_s5 + $0x98] sm:$0xff] %vm354_vm0, %v1488_v0 }
  0x2b PF: > { %v408_v1 = vld [vmem:[%s2393_s4 + $0x8] sm:$0xff]  ;;  %v407_v2 = vld [vmem:[%s2393_s4] sm:$0xff]  ;;  %vm409_vm1 = vcmask 130048   ;;  %v377_v7 = vld [vmem:[%s1542_s28 + $0x10] sm:$0xff]  ;;  %v747_v56 = vlaneseq }
  0x2c   : > { %520 = vmatpush.msra.mxu0 %v408_v1  ;;  %1436 = vmatpush.msra.mxu3 %v408_v1  ;;  %v375_v3 = vld [vmem:[%s1542_s28] sm:$0xff]  ;;  %v376_v5 = vld [vmem:[%s1542_s28 + $0x8] sm:$0xff]  ;;  %v397_v8 = vld [vmem:[%s1542_s28 + $0xb0] sm:$0xff] }
  0x2d   : > { %v395_v4 = vld [vmem:[%s1542_s28 + $0xa0] sm:$0xff]  ;;  %v396_v6 = vld [vmem:[%s1542_s28 + $0xa8] sm:$0xff]  ;;  %v378_v9 = vld [vmem:[%s1542_s28 + $0x18] sm:$0xff]  ;;  %v1738_v57 = vshrl.u32 %v747_v56, 7 }
  0x2e   : > { %521 = vmatpush.msra.mxu0 %v407_v2  ;;  %1437 = vmatpush.msra.mxu3 %v407_v2  ;;  %v398_v10 = vld [vmem:[%s1542_s28 + $0xb8] sm:$0xff]  ;;  %v379_v11 = vld [vmem:[%s1542_s28 + $0x20] sm:$0xff]  ;;  %v380_v13 = vld [vmem:[%s1542_s28 + $0x28] sm:$0xff] }
  0x2f   : > { %1289 = vmatmul.msk.f32.vlgmr.msra.gmra.mxu0 %vm409_vm1, %v375_v3  ;;  %1309 = vmatmul.msk.f32.vlgmr.msra.gmra.mxu3 %vm409_vm1, %v395_v4  ;;  %v399_v12 = vld [vmem:[%s1542_s28 + $0xc0] sm:$0xff]  ;;  %v400_v14 = vld [vmem:[%s1542_s28 + $0xc8] sm:$0xff]  ;;  %v381_v15 = vld [vmem:[%s1542_s28 + $0x30] sm:$0xff]  ;;  %v779_v60 = vadd.s32 248, %v1738_v57  ;;  %v778_v63 = vadd.s32 240, %v1738_v57  ;;  %v777_v3 = vadd.s32 232, %v1738_v57 }
  0x30   : > { %v401_v16 = vld [vmem:[%s1542_s28 + $0xd0] sm:$0xff]  ;;  %v382_v17 = vld [vmem:[%s1542_s28 + $0x38] sm:$0xff]  ;;  %v383_v19 = vld [vmem:[%s1542_s28 + $0x40] sm:$0xff] }
  0x31   : > { %v402_v18 = vld [vmem:[%s1542_s28 + $0xd8] sm:$0xff]  ;;  %v403_v20 = vld [vmem:[%s1542_s28 + $0xe0] sm:$0xff]  ;;  %v384_v21 = vld [vmem:[%s1542_s28 + $0x48] sm:$0xff] }
  0x32   : > { %v404_v22 = vld [vmem:[%s1542_s28 + $0xe8] sm:$0xff]  ;;  %v385_v23 = vld [vmem:[%s1542_s28 + $0x50] sm:$0xff]  ;;  %v386_v25 = vld [vmem:[%s1542_s28 + $0x58] sm:$0xff] }
  0x33   : > { %v405_v24 = vld [vmem:[%s1542_s28 + $0xf0] sm:$0xff]  ;;  %v406_v26 = vld [vmem:[%s1542_s28 + $0xf8] sm:$0xff]  ;;  %v387_v27 = vld [vmem:[%s1542_s28 + $0x60] sm:$0xff] }
  0x34   : > { %v388_v28 = vld [vmem:[%s1542_s28 + $0x68] sm:$0xff]  ;;  %v389_v29 = vld [vmem:[%s1542_s28 + $0x70] sm:$0xff]  ;;  %v390_v30 = vld [vmem:[%s1542_s28 + $0x78] sm:$0xff] }
  0x35   : > { %v391_v32 = vld [vmem:[%s1542_s28 + $0x80] sm:$0xff]  ;;  %v392_v35 = vld [vmem:[%s1542_s28 + $0x88] sm:$0xff]  ;;  %v393_v38 = vld [vmem:[%s1542_s28 + $0x90] sm:$0xff] }
  0x36   : > { %v394_v41 = vld [vmem:[%s1542_s28 + $0x98] sm:$0xff]  ;;  %s1321_s28 = sshll.u32 %s1526_s19, 8  ;;  %v649_v62 = vld [vmem:[%s1537_s25 + $0xf0] sm:$0xff]  ;;  %v648_v0 = vld [vmem:[%s1537_s25 + $0xe8] sm:$0xff] }
  0x37   : > { %1290 = vmatmul.msk.f32.gmra.mxu0 %vm409_vm1, %v376_v5  ;;  %1310 = vmatmul.msk.f32.gmra.mxu3 %vm409_vm1, %v396_v6  ;;  %v1744_v61 = vstv %s1321_s28  ;;  %v650_v1 = vld [vmem:[%s1537_s25 + $0xf8] sm:$0xff]  ;;  %v647_v5 = vld [vmem:[%s1537_s25 + $0xe0] sm:$0xff]  ;;  %v713_v6 = vld [vmem:[%s1547_s6 + $0xf0] sm:$0xff] }
  0x38   : > { %v1751_v2 = vadd.s32 %v1744_v61, %v779_v60 }
  0x3a   : > { %vm845_vm2 = vcmp.lt.s32.totalorder %v1751_v2, 640 }
  0x3f   : > { %1291 = vmatmul.msk.f32.gmra.mxu0 %vm409_vm1, %v377_v7  ;;  %1311 = vmatmul.msk.f32.gmra.mxu3 %vm409_vm1, %v397_v8  ;;  %v714_v8 = vld [vmem:[%s1547_s6 + $0xf8] sm:$0xff] }
  0x47   : > { %1292 = vmatmul.msk.f32.gmra.mxu0 %vm409_vm1, %v378_v9  ;;  %1312 = vmatmul.msk.f32.gmra.mxu3 %vm409_vm1, %v398_v10  ;;  %v1758_v9 = vadd.s32 %v1744_v61, %v778_v63  ;;  %v776_v10 = vadd.s32 224, %v1738_v57  ;;  %v708_v63 = vld [vmem:[%s1547_s6 + $0xc8] sm:$0xff] }
  0x49   : > { %vm844_vm3 = vcmp.lt.s32.totalorder %v1758_v9, 640 }
  0x4f   : > { %1293 = vmatmul.msk.f32.gmra.mxu0 %vm409_vm1, %v379_v11  ;;  %1313 = vmatmul.msk.f32.gmra.mxu3 %vm409_vm1, %v399_v12 }
  0x57   : > { %1294 = vmatmul.msk.f32.gmra.mxu0 %vm409_vm1, %v380_v13  ;;  %1314 = vmatmul.msk.f32.gmra.mxu3 %vm409_vm1, %v400_v14  ;;  %v712_v13 = vld [vmem:[%s1547_s6 + $0xe8] sm:$0xff] }
  0x5f   : > { %1295 = vmatmul.msk.f32.gmra.mxu0 %vm409_vm1, %v381_v15  ;;  %1315 = vmatmul.msk.f32.gmra.mxu3 %vm409_vm1, %v401_v16  ;;  %v1766_v15 = vadd.s32 %v1744_v61, %v777_v3  ;;  %v775_v16 = vadd.s32 216, %v1738_v57 }
  0x61   : > { %vm843_vm4 = vcmp.lt.s32.totalorder %v1766_v15, 640 }
  0x67   : > { %1296 = vmatmul.msk.f32.gmra.mxu0 %vm409_vm1, %v382_v17  ;;  %1316 = vmatmul.msk.f32.gmra.mxu3 %vm409_vm1, %v402_v18 }
  0x6f   : > { %1297 = vmatmul.msk.f32.gmra.mxu0 %vm409_vm1, %v383_v19  ;;  %1317 = vmatmul.msk.f32.gmra.mxu3 %vm409_vm1, %v403_v20  ;;  %v646_v20 = vld [vmem:[%s1537_s25 + $0xd8] sm:$0xff] }
  0x77   : > { %1298 = vmatmul.msk.f32.gmra.mxu0 %vm409_vm1, %v384_v21  ;;  %1318 = vmatmul.msk.f32.gmra.mxu3 %vm409_vm1, %v404_v22  ;;  %v711_v21 = vld [vmem:[%s1547_s6 + $0xe0] sm:$0xff]  ;;  %v1777_v22 = vadd.s32 %v1744_v61, %v776_v10  ;;  %v640_v10 = vld [vmem:[%s1537_s25 + $0xa8] sm:$0xff] }
  0x79   : > { %vm842_vm5 = vcmp.lt.s32.totalorder %v1777_v22, 640 }
  0x7f   : > { %1299 = vmatmul.msk.f32.gmra.mxu0 %vm409_vm1, %v385_v23  ;;  %1319 = vmatmul.msk.f32.gmra.mxu3 %vm409_vm1, %v405_v24  ;;  %v774_v23 = vadd.s32 208, %v1738_v57 }
  0x87   : > { %1300 = vmatmul.msk.f32.gmra.mxu0 %vm409_vm1, %v386_v25  ;;  %1320 = vmatmul.msk.f32.gmra.mxu3 %vm409_vm1, %v406_v26  ;;  %v645_v25 = vld [vmem:[%s1537_s25 + $0xd0] sm:$0xff]  ;;  %v1788_v26 = vadd.s32 %v1744_v61, %v775_v16 }
  0x89   : > { %vm841_vm6 = vcmp.lt.s32.totalorder %v1788_v26, 640  ;;  %v1001_v26 = vld [vmem:[%s2394_s5] sm:$0xff] }
  0x8f   : > { %1301 = vmatmul.msk.f32.gmra.mxu0 %vm409_vm1, %v387_v27  ;;  %v773_v27 = vadd.s32 200, %v1738_v57 }
  0x91   : > { %v1812_v56 = vadd.s32 %v1744_v61, %v773_v27  ;;  %v704_v27 = vld [vmem:[%s1547_s6 + $0xa8] sm:$0xff] }
  0x93   : > { %vm839_vm8 = vcmp.lt.s32.totalorder %v1812_v56, 640 }
  0x97   : > { %1302 = vmatmul.msk.f32.gmra.mxu0 %vm409_vm1, %v388_v28 }
  0x9f   : > { %1303 = vmatmul.msk.f32.gmra.mxu0 %vm409_vm1, %v389_v29 }
  0xa7   : > { %1304 = vmatmul.msk.f32.gmra.mxu0 %vm409_vm1, %v390_v30  ;;  %v644_v30 = vld [vmem:[%s1537_s25 + $0xc8] sm:$0xff] }
  0xac   : > { %v1696_v31 = vpop.f32.mrf.mxu0 }
  0xaf   : > { %1305 = vmatmul.msk.f32.gmra.mxu0 %vm409_vm1, %v391_v32  ;;  %v710_v32 = vld [vmem:[%s1547_s6 + $0xd8] sm:$0xff] }
  0xb2   : > { %v1700_v33 = vpop.f32.mrf.mxu3 }
  0xb4   : > { %v1702_v34 = vpop.f32.mrf.mxu0 }
  0xb7   : > { %1306 = vmatmul.msk.f32.gmra.mxu0 %vm409_vm1, %v392_v35  ;;  %v1800_v35 = vadd.s32 %v1744_v61, %v774_v23 }
  0xb9   : > { %vm840_vm7 = vcmp.lt.s32.totalorder %v1800_v35, 640 }
  0xba   : > { %v1706_v36 = vpop.f32.mrf.mxu3 }
  0xbc   : > { %v1708_v37 = vpop.f32.mrf.mxu0 }
  0xbf   : > { %1307 = vmatmul.msk.f32.gmra.mxu0 %vm409_vm1, %v393_v38  ;;  %v772_v38 = vadd.s32 192, %v1738_v57 }
  0xc2   : > { %v1712_v39 = vpop.f32.mrf.mxu3 }
  0xc4   : > { %v1714_v40 = vpop.f32.mrf.mxu0 }
  0xc7   : > { %1308 = vmatmul.msk.f32.gmra.mxu0 %vm409_vm1, %v394_v41 }
  0xca   : > { %v1718_v42 = vpop.f32.mrf.mxu3 }
  0xcc   : > { %v1720_v43 = vpop.f32.mrf.mxu0 }
  0xd2   : > { %v1722_v44 = vpop.f32.mrf.mxu3 }
  0xd4   : > { %v1724_v45 = vpop.f32.mrf.mxu0 }
  0xda   : > { %v1726_v46 = vpop.f32.mrf.mxu3 }
  0xdb   : > { %v676_v60 = vadd.f32 %v644_v30, %v1726_v46  ;;  %v1878_v30 = vadd.s32 120, %v1738_v57 }
  0xdc   : > { %v1728_v47 = vpop.f32.mrf.mxu0 }
  0xdd   : > { %2405 = vst [vmem:[#allocation2_spill] sm:$0xff] %v1878_v30 }
  0xe2   : > { %v601_v48 = vpop.f32.mrf.mxu3 }
  0xe3   : > { %v677_v41 = vadd.f32 %v645_v25, %v601_v48  ;;  %v672_v25 = vadd.f32 %v640_v10, %v1706_v36  ;;  %v631_v10 = vld [vmem:[%s1537_s25 + $0x60] sm:$0xff] }
  0xe4   : > { %v1730_v49 = vpop.f32.mrf.mxu0 }
  0xea   : > { %v604_v50 = vpop.f32.mrf.mxu3 }
  0xeb   : > { %v678_v28 = vadd.f32 %v646_v20, %v604_v50  ;;  %v643_v50 = vld [vmem:[%s1537_s25 + $0xc0] sm:$0xff]  ;;  %v705_v20 = vld [vmem:[%s1547_s6 + $0xb0] sm:$0xff] }
  0xec   : > { %v1732_v51 = vpop.f32.mrf.mxu0  ;;  %v675_v3 = vadd.f32 %v643_v50, %v1722_v44  ;;  %v1842_v44 = vmul.f32 %v708_v63, %v676_v60  ;;  %v1891_v50 = vmul.f32 %v704_v27, %v672_v25  ;;  %v1902_v60 = vadd.s32 104, %v1738_v57  ;;  %v632_v63 = vld [vmem:[%s1537_s25 + $0x68] sm:$0xff] }
  0xed   : > { %v1816_v48 = vmul.f32 %v710_v32, %v678_v28  ;;  %v696_v25 = vld [vmem:[%s1547_s6 + $0x68] sm:$0xff] }
  0xee   : > { %2407 = vst [vmem:[#allocation4_spill] sm:$0xff] %v1902_v60 }
  0xf2   : > { %v607_v52 = vpop.f32.mrf.mxu3 }
  0xf3   : > { %v679_v17 = vadd.f32 %v647_v5, %v607_v52  ;;  %v709_v52 = vld [vmem:[%s1547_s6 + $0xd0] sm:$0xff]  ;;  %v707_v5 = vld [vmem:[%s1547_s6 + $0xc0] sm:$0xff] }
  0xf4   : > { %v1734_v53 = vpop.f32.mrf.mxu0  ;;  %v1829_v46 = vmul.f32 %v709_v52, %v677_v41  ;;  %v1889_v41 = vadd.s32 112, %v1738_v57  ;;  %v634_v52 = vld [vmem:[%s1537_s25 + $0x78] sm:$0xff] }
  0xf5   : > { %v1791_v29 = vmul.f32 %v711_v21, %v679_v17  ;;  %v1855_v17 = vmul.f32 %v707_v5, %v675_v3  ;;  %v698_v3 = vld [vmem:[%s1547_s6 + $0x78] sm:$0xff]  ;;  %v1914_v5 = vadd.s32 96, %v1738_v57  ;;  %v2412_v15 = vld [vmem:[#allocation4_spill] sm:$0xff] }
  0xf6   : > { %2406 = vst [vmem:[#allocation3_spill] sm:$0xff] %v1889_v41 }
  0xf7   : > { %2408 = vst [vmem:[#allocation5_spill] sm:$0xff] %v1914_v5  ;;  %v794_v27 = vadd.s32 %v1744_v61, %v1914_v5 }
  0xf9   : > { %vm826_vm1 = vcmp.lt.s32.totalorder %v794_v27, 640 }
  0xfa   : > { %v610_v54 = vpop.f32.mrf.mxu3 }
  0xfb   : > { %v680_v11 = vadd.f32 %v648_v0, %v610_v54  ;;  %v1825_v0 = vadd.s32 %v1744_v61, %v772_v38  ;;  %v703_v38 = vld [vmem:[%s1547_s6 + $0xa0] sm:$0xff] }
  0xfc   : > { %v1736_v55 = vpop.f32.mrf.mxu0 }
  0xfd   : > { %v1780_v24 = vmul.f32 %v712_v13, %v680_v11  ;;  %v706_v11 = vld [vmem:[%s1547_s6 + $0xb8] sm:$0xff]  ;;  %vm838_vm9 = vcmp.lt.s32.totalorder %v1825_v0, 640  ;;  %v768_v13 = vadd.s32 160, %v1738_v57  ;;  %v1002_v0 = vld [vmem:[%s2394_s5 + $0x8] sm:$0xff] }
  0xfe   : > { %v2411_v9 = vld [vmem:[#allocation5_spill] sm:$0xff] }
  0xff   : > { %v1875_v28 = vadd.s32 %v1744_v61, %v768_v13  ;;  %v795_v13 = vadd.s32 %v1744_v61, %v1902_v60  ;;  %v2063_v60 = vadd.s32 128, %v1738_v57 }
 0x101   : > { %vm834_vm13 = vcmp.lt.s32.totalorder %v1875_v28, 640  ;;  %vm827_vm0 = vcmp.lt.s32.totalorder %v795_v13, 640 }
 0x102   : > { %v613_v58 = vpop.f32.mrf.mxu3 }
 0x103   : > { %v681_v4 = vadd.f32 %v649_v62, %v613_v58  ;;  %v771_v58 = vadd.s32 184, %v1738_v57  ;;  %v642_v62 = vld [vmem:[%s1537_s25 + $0xb8] sm:$0xff] }
 0x104   : > { %v1741_v59 = vpop.f32.mrf.mxu0 }
 0x105   : > { %v1769_v18 = vmul.f32 %v713_v6, %v681_v4  ;;  %v641_v4 = vld [vmem:[%s1537_s25 + $0xb0] sm:$0xff]  ;;  %v1838_v6 = vadd.s32 %v1744_v61, %v771_v58  ;;  %v797_v58 = vadd.s32 %v1744_v61, %v1878_v30 }
 0x106   : > { %v673_v16 = vadd.f32 %v641_v4, %v1712_v39  ;;  %v796_v4 = vadd.s32 %v1744_v61, %v1889_v41 }
 0x107   : > { %vm837_vm10 = vcmp.lt.s32.totalorder %v1838_v6, 640  ;;  %vm829_vm14 = vcmp.lt.s32.totalorder %v797_v58, 640  ;;  %v695_v58 = vld [vmem:[%s1547_s6 + $0x60] sm:$0xff] }
 0x108   : > { %v1881_v36 = vmul.f32 %v705_v20, %v673_v16  ;;  %v1924_v16 = vadd.s32 88, %v1738_v57  ;;  %vm828_vm15 = vcmp.lt.s32.totalorder %v796_v4, 640  ;;  %v694_v4 = vld [vmem:[%s1547_s6 + $0x58] sm:$0xff] }
 0x10a   : > { %v616_v7 = vpop.f32.mrf.mxu3  ;;  %2409 = vst [vmem:[#allocation6_spill] sm:$0xff] %v1924_v16 }
 0x10b   : > { %v682_v12 = vadd.f32 %v650_v1, %v616_v7  ;;  %v770_v1 = vadd.s32 176, %v1738_v57  ;;  %v769_v7 = vadd.s32 168, %v1738_v57 }
 0x10c   : > { %v1762_v14 = vpop.f32.mrf.mxu0 }
 0x10d   : > { %v1771_v19 = vmul.f32 %v714_v8, %v682_v12  ;;  %v674_v8 = vadd.f32 %v642_v62, %v1718_v42  ;;  %v1851_v12 = vadd.s32 %v1744_v61, %v770_v1  ;;  %v639_v42 = vld [vmem:[%s1537_s25 + $0xa0] sm:$0xff]  ;;  %v1864_v23 = vadd.s32 %v1744_v61, %v769_v7 }
 0x10e   : > { %v671_v32 = vadd.f32 %v639_v42, %v1700_v33  ;;  %v633_v33 = vld [vmem:[%s1537_s25 + $0x70] sm:$0xff] }
 0x10f   : > { %1398 = vmatpush.msk.msra.mxu2 %vm845_vm2, %v1771_v19  ;;  %v1867_v39 = vmul.f32 %v706_v11, %v674_v8  ;;  %vm836_vm11 = vcmp.lt.s32.totalorder %v1851_v12, 640  ;;  %vm835_vm12 = vcmp.lt.s32.totalorder %v1864_v23, 640  ;;  %v697_v11 = vld [vmem:[%s1547_s6 + $0x70] sm:$0xff] }
 0x110   : > { %v1904_v62 = vmul.f32 %v703_v38, %v671_v32  ;;  %v1932_v32 = vadd.s32 80, %v1738_v57  ;;  %v663_v38 = vadd.f32 %v631_v10, %v1762_v14  ;;  %v628_v14 = vld [vmem:[%s1537_s25 + $0x48] sm:$0xff]  ;;  %v1950_v10 = vadd.s32 64, %v1738_v57 }
 0x111   : > { %1399 = vmatpush.msk.msra.mxu2 %vm844_vm3, %v1769_v18  ;;  %v660_v27 = vadd.f32 %v628_v14, %v1734_v53  ;;  %v625_v53 = vld [vmem:[%s1537_s25 + $0x30] sm:$0xff]  ;;  %v1976_v14 = vadd.s32 40, %v1738_v57 }
 0x112   : > { %v790_v13 = vadd.s32 %v1744_v61, %v1950_v10 }
 0x113   : > { %1400 = vmatpush.msk.msra.mxu2 %vm843_vm4, %v1780_v24 }
 0x114   : > { %v1808_v54 = vpop.f32.mrf.mxu0 }
 0x115   : > { %1401 = vmatpush.msk.msra.mxu2 %vm842_vm5, %v1791_v29  ;;  %v664_v42 = vadd.f32 %v632_v63, %v1808_v54  ;;  %v793_v54 = vadd.s32 %v1744_v61, %v1924_v16  ;;  %v1940_v63 = vadd.s32 72, %v1738_v57 }
 0x117   : > { %1402 = vmatpush.msk.msra.mxu2 %vm841_vm6, %v1816_v48 }
 0x119   : > { %1403 = vmatpush.msk.msra.mxu2 %vm840_vm7, %v1829_v46 }
 0x11b   : > { %1404 = vmatpush.msk.msra.mxu2 %vm839_vm8, %v1842_v44 }
 0x11c   : > { %v565_v21 = vpop.f32.mrf.mxu0 }
 0x11d   : > { %1405 = vmatpush.msk.msra.mxu2 %vm838_vm9, %v1855_v17  ;;  %v665_v7 = vadd.f32 %v633_v33, %v565_v21  ;;  %v630_v21 = vld [vmem:[%s1537_s25 + $0x58] sm:$0xff] }
 0x11f   : > { %1406 = vmatpush.msk.msra.mxu2 %vm837_vm10, %v1867_v39  ;;  %v729_v33 = vmul.f32 %v697_v11, %v665_v7 }
 0x121   : > { %1407 = vmatpush.msk.msra.mxu2 %vm836_vm11, %v1881_v36 }
 0x123   : > { %1408 = vmatpush.msk.msra.mxu2 %vm835_vm12, %v1891_v50 }
 0x124   : > { %v568_v1 = vpop.f32.mrf.mxu0 }
 0x125   : > { %v666_v8 = vadd.f32 %v634_v52, %v568_v1  ;;  %1409 = vmatpush.msk.msra.mxu2 %vm834_vm13, %v1904_v62  ;;  %v629_v52 = vld [vmem:[%s1537_s25 + $0x50] sm:$0xff]  ;;  %v662_v1 = vadd.f32 %v630_v21, %v1741_v59  ;;  %v627_v59 = vld [vmem:[%s1537_s25 + $0x40] sm:$0xff]  ;;  %v791_v21 = vadd.s32 %v1744_v61, %v1940_v63 }
 0x126   : > { %v661_v11 = vadd.f32 %v629_v52, %v1736_v55  ;;  %v626_v55 = vld [vmem:[%s1537_s25 + $0x38] sm:$0xff]  ;;  %v1968_v52 = vadd.s32 48, %v1738_v57 }
 0x127   : > { %v730_v20 = vmul.f32 %v698_v3, %v666_v8  ;;  %v728_v3 = vmul.f32 %v696_v25, %v664_v42  ;;  %v792_v8 = vadd.s32 %v1744_v61, %v1932_v32  ;;  %v693_v42 = vld [vmem:[%s1547_s6 + $0x50] sm:$0xff]  ;;  %v1960_v25 = vadd.s32 56, %v1738_v57 }
 0x129   : > { %1362 = vmatpush.msk.msra.mxu1 %vm829_vm14, %v730_v20  ;;  %1438 = vmatpush.msk.msrb.mxu3 %vm829_vm14, %v730_v20  ;;  %v727_v20 = vmul.f32 %v695_v58, %v663_v38  ;;  %vm825_vm14 = vcmp.lt.s32.totalorder %v793_v54, 640  ;;  %v692_v38 = vld [vmem:[%s1547_s6 + $0x48] sm:$0xff]  ;;  %v659_v58 = vadd.f32 %v627_v59, %v1732_v51  ;;  %v725_v54 = vmul.f32 %v693_v42, %v661_v11  ;;  %v690_v11 = vld [vmem:[%s1547_s6 + $0x38] sm:$0xff] }
 0x12a   : > { %v624_v51 = vld [vmem:[%s1537_s25 + $0x28] sm:$0xff]  ;;  %v788_v59 = vadd.s32 %v1744_v61, %v1968_v52  ;;  %v1986_v42 = vadd.s32 32, %v1738_v57 }
 0x12b   : > { %1363 = vmatpush.msk.msra.mxu1 %vm828_vm15, %v729_v33  ;;  %1439 = vmatpush.msk.msrb.mxu3 %vm828_vm15, %v729_v33  ;;  %v726_v33 = vmul.f32 %v694_v4, %v662_v1  ;;  %vm824_vm15 = vcmp.lt.s32.totalorder %v792_v8, 640  ;;  %v691_v1 = vld [vmem:[%s1547_s6 + $0x40] sm:$0xff]  ;;  %v658_v4 = vadd.f32 %v626_v55, %v1730_v49  ;;  %v724_v8 = vmul.f32 %v692_v38, %v660_v27  ;;  %v689_v27 = vld [vmem:[%s1547_s6 + $0x30] sm:$0xff] }
 0x12c   : > { %v1945_v7 = vpop.f32.mrf.mxu0  ;;  %v723_v30 = vmul.f32 %v691_v1, %v659_v58  ;;  %v623_v49 = vld [vmem:[%s1537_s25 + $0x20] sm:$0xff]  ;;  %v787_v55 = vadd.s32 %v1744_v61, %v1976_v14  ;;  %v1996_v38 = vadd.s32 24, %v1738_v57  ;;  %v688_v58 = vld [vmem:[%s1547_s6 + $0x28] sm:$0xff] }
 0x12d   : > { %1364 = vmatpush.msk.msra.mxu1 %vm827_vm0, %v728_v3  ;;  %1440 = vmatpush.msk.msrb.mxu3 %vm827_vm0, %v728_v3  ;;  %vm823_vm0 = vcmp.lt.s32.totalorder %v791_v21, 640  ;;  %v789_v3 = vadd.s32 %v1744_v61, %v1960_v25  ;;  %v786_v21 = vadd.s32 %v1744_v61, %v1986_v42  ;;  %v655_v1 = vadd.f32 %v623_v49, %v1720_v43  ;;  %v620_v43 = vld [vmem:[%s1537_s25 + $0x8] sm:$0xff] }
 0x12f   : > { %1365 = vmatpush.msk.msra.mxu1 %vm826_vm1, %v727_v20  ;;  %1441 = vmatpush.msk.msrb.mxu3 %vm826_vm1, %v727_v20  ;;  %vm822_vm1 = vcmp.lt.s32.totalorder %v790_v13, 640  ;;  %v656_v13 = vadd.f32 %v624_v51, %v1724_v45  ;;  %v621_v45 = vld [vmem:[%s1537_s25 + $0x10] sm:$0xff] }
 0x131   : > { %1366 = vmatpush.msk.msra.mxu1 %vm825_vm14, %v726_v33  ;;  %1442 = vmatpush.msk.msrb.mxu3 %vm825_vm14, %v726_v33  ;;  %v657_v33 = vadd.f32 %v625_v53, %v1728_v47  ;;  %vm821_vm14 = vcmp.lt.s32.totalorder %v789_v3, 640  ;;  %v622_v47 = vld [vmem:[%s1537_s25 + $0x18] sm:$0xff]  ;;  %v2004_v53 = vadd.s32 16, %v1738_v57 }
 0x132   : > { %v654_v51 = vadd.f32 %v622_v47, %v1714_v40  ;;  %v685_v40 = vld [vmem:[%s1547_s6 + $0x10] sm:$0xff]  ;;  %v2027_v47 = vadd.s32 152, %v1738_v57 }
 0x133   : > { %1367 = vmatpush.msk.msra.mxu1 %vm824_vm15, %v725_v54  ;;  %1443 = vmatpush.msk.msrb.mxu3 %vm824_vm15, %v725_v54  ;;  %v722_v54 = vmul.f32 %v690_v11, %v658_v4  ;;  %vm820_vm15 = vcmp.lt.s32.totalorder %v788_v59, 640  ;;  %v721_v3 = vmul.f32 %v689_v27, %v657_v33  ;;  %v687_v4 = vld [vmem:[%s1547_s6 + $0x20] sm:$0xff]  ;;  %v720_v11 = vmul.f32 %v688_v58, %v656_v13  ;;  %v686_v59 = vld [vmem:[%s1547_s6 + $0x18] sm:$0xff] }
 0x134   : > { %v1981_v20 = vpop.f32.mrf.mxu0  ;;  %v784_v49 = vadd.s32 %v1744_v61, %v2004_v53  ;;  %v619_v27 = vld [vmem:[%s1537_s25] sm:$0xff]  ;;  %v719_v41 = vmul.f32 %v687_v4, %v655_v1  ;;  %v652_v58 = vadd.f32 %v620_v43, %v1702_v34  ;;  %v782_v1 = vadd.s32 %v1744_v61, %v1738_v57 }
 0x135   : > { %1368 = vmatpush.msk.msra.mxu1 %vm823_vm0, %v724_v8  ;;  %1444 = vmatpush.msk.msrb.mxu3 %vm823_vm0, %v724_v8  ;;  %vm819_vm0 = vcmp.lt.s32.totalorder %v787_v55, 640  ;;  %v2012_v8 = vadd.s32 8, %v1738_v57  ;;  %v684_v55 = vld [vmem:[%s1547_s6 + $0x8] sm:$0xff]  ;;  %v878_v34 = vld [vmem:[%s345_s9] sm:$0x3]  ;;  %v2054_v43 = vadd.s32 136, %v1738_v57 }
 0x137   : > { %1369 = vmatpush.msk.msra.mxu1 %vm822_vm1, %v723_v30  ;;  %1445 = vmatpush.msk.msrb.mxu3 %vm822_vm1, %v723_v30  ;;  %v785_v30 = vadd.s32 %v1744_v61, %v1996_v38  ;;  %vm818_vm1 = vcmp.lt.s32.totalorder %v786_v21, 640  ;;  %v783_v13 = vadd.s32 %v1744_v61, %v2012_v8  ;;  %v651_v21 = vadd.f32 %v619_v27, %v1696_v31  ;;  %v636_v27 = vld [vmem:[%s1537_s25 + $0x88] sm:$0xff] }
 0x138   : > { %v2045_v31 = vperm.slane %v878_v34, 0 }
 0x139   : > { %1370 = vmatpush.msk.msra.mxu1 %vm821_vm14, %v722_v54  ;;  %1446 = vmatpush.msk.msrb.mxu3 %vm821_vm14, %v722_v54  ;;  %v653_v54 = vadd.f32 %v621_v45, %v1708_v37  ;;  %vm817_vm14 = vcmp.lt.s32.totalorder %v785_v30, 640  ;;  %v718_v37 = vmul.f32 %v686_v59, %v654_v51  ;;  %v683_v45 = vld [vmem:[%s1547_s6] sm:$0xff]  ;;  %v638_v51 = vld [vmem:[%s1537_s25 + $0x98] sm:$0xff]  ;;  %v716_v59 = vmul.f32 %v684_v55, %v652_v58  ;;  %v701_v58 = vld [vmem:[%s1547_s6 + $0x90] sm:$0xff] }
 0x13a   : > { %v715_v30 = vmul.f32 %v683_v45, %v651_v21  ;;  %v799_v21 = vadd.s32 %v1744_v61, %v2054_v43  ;;  %v668_v55 = vadd.f32 %v636_v27, %v1981_v20  ;;  %v1489_v45 = vmov 1.0   ;;  %v699_v20 = vld [vmem:[%s1547_s6 + $0x80] sm:$0xff] }
 0x13b   : > { %1371 = vmatpush.msk.msra.mxu1 %vm820_vm15, %v721_v3  ;;  %1447 = vmatpush.msk.msrb.mxu3 %vm820_vm15, %v721_v3  ;;  %vm816_vm15 = vcmp.lt.s32.totalorder %v784_v49, 640  ;;  %v2035_v3 = vadd.s32 144, %v1738_v57  ;;  %v717_v4 = vmul.f32 %v685_v40, %v653_v54  ;;  %v702_v40 = vld [vmem:[%s1547_s6 + $0x98] sm:$0xff]  ;;  %v635_v49 = vld [vmem:[%s1537_s25 + $0x80] sm:$0xff] }
 0x13c   : > { %v577_v33 = vpop.f32.mrf.mxu0 }
 0x13d   : > { %1372 = vmatpush.msk.msra.mxu1 %vm819_vm0, %v720_v11  ;;  %1448 = vmatpush.msk.msrb.mxu3 %vm819_vm0, %v720_v11  ;;  %vm815_vm0 = vcmp.lt.s32.totalorder %v783_v13, 640  ;;  %v2051_v11 = vadd.s32 %v1744_v61, %v2027_v47  ;;  %v798_v13 = vadd.s32 %v1744_v61, %v2063_v60 }
 0x13f   : > { %1373 = vmatpush.msk.msra.mxu1 %vm818_vm1, %v719_v41  ;;  %1449 = vmatpush.msk.msrb.mxu3 %vm818_vm1, %v719_v41  ;;  %v637_v41 = vld [vmem:[%s1537_s25 + $0x90] sm:$0xff]  ;;  %vm814_vm1 = vcmp.lt.s32.totalorder %v782_v1, 640 }
 0x140   : > { %v669_v5 = vadd.f32 %v637_v41, %v577_v33  ;;  %v700_v33 = vld [vmem:[%s1547_s6 + $0x88] sm:$0xff] }
 0x141   : > { %1374 = vmatpush.msk.msra.mxu1 %vm817_vm14, %v718_v37  ;;  %1450 = vmatpush.msk.msrb.mxu3 %vm817_vm14, %v718_v37  ;;  %v800_v37 = vadd.s32 %v1744_v61, %v2035_v3  ;;  %vm881_vm14 = vcmp.eq.s32.totalorder %v1738_v57, %v2045_v31  ;;  %v732_v2 = vmul.f32 %v700_v33, %v668_v55 }
 0x142   : > { %v733_v41 = vmul.f32 %v701_v58, %v669_v5 }
 0x143   : > { %1375 = vmatpush.msk.msra.mxu1 %vm816_vm15, %v717_v4  ;;  %1451 = vmatpush.msk.msrb.mxu3 %vm816_vm15, %v717_v4  ;;  %vm833_vm15 = vcmp.lt.s32.totalorder %v2051_v11, 640  ;;  %v667_v4 = vadd.f32 %v635_v49, %v1945_v7  ;;  %v1005_v7 = vld [vmem:[%s2394_s5 + $0x20] sm:$0xff]  ;;  %v1018_v49 = vld [vmem:[%s2394_s5 + $0x88] sm:$0xff] }
 0x144   : > { %v580_v54 = vpop.f32.mrf.mxu0 }
 0x145   : > { %v670_v16 = vadd.f32 %v638_v51, %v580_v54  ;;  %1376 = vmatpush.msk.msra.mxu1 %vm815_vm0, %v716_v59  ;;  %1452 = vmatpush.msk.msrb.mxu3 %vm815_vm0, %v716_v59  ;;  %vm832_vm0 = vcmp.lt.s32.totalorder %v800_v37, 640  ;;  %v731_v61 = vmul.f32 %v699_v20, %v667_v4 }
 0x147   : > { %v734_v1 = vmul.f32 %v702_v40, %v670_v16  ;;  %1377 = vmatpush.msk.msra.mxu1 %vm814_vm1, %v715_v30  ;;  %1453 = vmatpush.msk.msrb.mxu3 %vm814_vm1, %v715_v30  ;;  %v2085_v16 = vperm.slane %v878_v34, 1  ;;  %vm830_vm1 = vcmp.lt.s32.totalorder %v798_v13, 640  ;;  %v1008_v30 = vld [vmem:[%s2394_s5 + $0x38] sm:$0xff] }
 0x148   : > { %1378 = vmatmul.msk.f32.vlgmr.msra.gmra.mxu1 %vm881_vm14, %v1489_v45 }
 0x149   : > { %1454 = vmatpush.msk.msra.mxu3 %vm845_vm2, %v1771_v19  ;;  %1410 = vmatpush.msk.msra.mxu2 %vm833_vm15, %v734_v1  ;;  %vm831_vm2 = vcmp.lt.s32.totalorder %v799_v21, 640  ;;  %vm882_vm14 = vcmp.eq.s32.totalorder %v1738_v57, %v2085_v16  ;;  %v2410_v57 = vld [vmem:[#allocation6_spill] sm:$0xff] }
 0x14a   : > { %v2414_v19 = vld [vmem:[#allocation2_spill] sm:$0xff] }
 0x14b   : > { %1455 = vmatpush.msk.msra.mxu3 %vm844_vm3, %v1769_v18  ;;  %1411 = vmatpush.msk.msra.mxu2 %vm832_vm0, %v733_v41  ;;  %vm883_vm3 = vcmp.eq.s32.totalorder %v2012_v8, %v2045_v31  ;;  %v2413_v18 = vld [vmem:[#allocation3_spill] sm:$0xff] }
 0x14d   : > { %1456 = vmatpush.msk.msra.mxu3 %vm843_vm4, %v1780_v24  ;;  %1412 = vmatpush.msk.msra.mxu2 %vm831_vm2, %v732_v2  ;;  %vm884_vm4 = vcmp.eq.s32.totalorder %v2012_v8, %v2085_v16 }
 0x14f   : > { %1457 = vmatpush.msk.msra.mxu3 %vm842_vm5, %v1791_v29  ;;  %1413 = vmatpush.msk.msra.mxu2 %vm830_vm1, %v731_v61  ;;  %vm885_vm5 = vcmp.eq.s32.totalorder %v2004_v53, %v2045_v31 }
 0x150   : > { %1414 = vmatmul.msk.f32.vlgmr.msra.gmra.mxu2 %vm882_vm14, %v1489_v45  ;;  %1379 = vmatmul.msk.f32.gmra.mxu1 %vm883_vm3, %v1489_v45  ;;  %vm895_vm14 = vcmp.eq.s32.totalorder %v1960_v25, %v2045_v31  ;;  %vm896_vm3 = vcmp.eq.s32.totalorder %v1960_v25, %v2085_v16 }
 0x151   : > { %1458 = vmatpush.msk.msra.mxu3 %vm841_vm6, %v1816_v48  ;;  %vm886_vm6 = vcmp.eq.s32.totalorder %v2004_v53, %v2085_v16 }
 0x153   : > { %1459 = vmatpush.msk.msra.mxu3 %vm840_vm7, %v1829_v46  ;;  %vm887_vm7 = vcmp.eq.s32.totalorder %v1996_v38, %v2045_v31 }
 0x155   : > { %1460 = vmatpush.msk.msra.mxu3 %vm839_vm8, %v1842_v44  ;;  %vm888_vm8 = vcmp.eq.s32.totalorder %v1996_v38, %v2085_v16  ;;  %v1006_v38 = vld [vmem:[%s2394_s5 + $0x28] sm:$0xff] }
 0x157   : > { %1461 = vmatpush.msk.msra.mxu3 %vm838_vm9, %v1855_v17  ;;  %vm889_vm9 = vcmp.eq.s32.totalorder %v1986_v42, %v2045_v31  ;;  %v1003_v17 = vld [vmem:[%s2394_s5 + $0x10] sm:$0xff] }
 0x158   : > { %1415 = vmatmul.msk.f32.gmra.mxu2 %vm884_vm4, %v1489_v45  ;;  %1380 = vmatmul.msk.f32.gmra.mxu1 %vm885_vm5, %v1489_v45  ;;  %vm897_vm4 = vcmp.eq.s32.totalorder %v1950_v10, %v2045_v31  ;;  %vm916_vm5 = vcmp.eq.s32.totalorder %v2054_v43, %v2085_v16 }
 0x159   : > { %1462 = vmatpush.msk.msra.mxu3 %vm837_vm10, %v1867_v39  ;;  %vm915_vm10 = vcmp.eq.s32.totalorder %v2054_v43, %v2045_v31 }
 0x15a   : > { %1395 = vmatmul.msk.f32.vlgmr.msrb.gmra.mxu3 %vm915_vm10, %v1489_v45  ;;  %vm901_vm10 = vcmp.eq.s32.totalorder %v1932_v32, %v2045_v31 }
 0x15b   : > { %1463 = vmatpush.msk.msra.mxu3 %vm836_vm11, %v1881_v36  ;;  %vm890_vm11 = vcmp.eq.s32.totalorder %v1986_v42, %v2085_v16 }
 0x15d   : > { %1464 = vmatpush.msk.msra.mxu3 %vm835_vm12, %v1891_v50  ;;  %vm891_vm12 = vcmp.eq.s32.totalorder %v1976_v14, %v2045_v31  ;;  %v1004_v50 = vld [vmem:[%s2394_s5 + $0x18] sm:$0xff] }
 0x15f   : > { %1465 = vmatpush.msk.msra.mxu3 %vm834_vm13, %v1904_v62  ;;  %vm917_vm13 = vcmp.eq.s32.totalorder %v2035_v3, %v2045_v31 }
 0x160   : > { %1416 = vmatmul.msk.f32.gmra.mxu2 %vm886_vm6, %v1489_v45  ;;  %1381 = vmatmul.msk.f32.gmra.mxu1 %vm887_vm7, %v1489_v45  ;;  %vm898_vm6 = vcmp.eq.s32.totalorder %v1950_v10, %v2085_v16  ;;  %vm899_vm7 = vcmp.eq.s32.totalorder %v1940_v63, %v2045_v31 }
 0x161   : > { %1466 = vmatpush.msk.msra.mxu3 %vm833_vm15, %v734_v1  ;;  %vm892_vm15 = vcmp.eq.s32.totalorder %v1976_v14, %v2085_v16  ;;  %v1009_v1 = vld [vmem:[%s2394_s5 + $0x40] sm:$0xff] }
 0x162   : > { %1396 = vmatmul.msk.f32.gmra.mxu3 %vm917_vm13, %v1489_v45  ;;  %vm903_vm13 = vcmp.eq.s32.totalorder %v2410_v57, %v2045_v31 }
 0x163   : > { %1467 = vmatpush.msk.msra.mxu3 %vm832_vm0, %v733_v41  ;;  %vm893_vm0 = vcmp.eq.s32.totalorder %v1968_v52, %v2045_v31  ;;  %v1019_v41 = vld [vmem:[%s2394_s5 + $0x90] sm:$0xff] }
 0x165   : > { %1468 = vmatpush.msk.msra.mxu3 %vm831_vm2, %v732_v2  ;;  %vm919_vm2 = vcmp.eq.s32.totalorder %v2027_v47, %v2045_v31 }
 0x167   : > { %1469 = vmatpush.msk.msra.mxu3 %vm830_vm1, %v731_v61  ;;  %vm894_vm1 = vcmp.eq.s32.totalorder %v1968_v52, %v2085_v16  ;;  %v1010_v61 = vld [vmem:[%s2394_s5 + $0x48] sm:$0xff] }
 0x168   : > { %1417 = vmatmul.msk.f32.gmra.mxu2 %vm888_vm8, %v1489_v45  ;;  %1382 = vmatmul.msk.f32.gmra.mxu1 %vm889_vm9, %v1489_v45  ;;  %vm918_vm8 = vcmp.eq.s32.totalorder %v2035_v3, %v2085_v16  ;;  %vm900_vm9 = vcmp.eq.s32.totalorder %v1940_v63, %v2085_v16 }
 0x16a   : > { %1397 = vmatmul.msk.f32.gmra.mxu3 %vm919_vm2, %v1489_v45  ;;  %vm906_vm2 = vcmp.eq.s32.totalorder %v2411_v9, %v2085_v16 }
 0x170   : > { %1418 = vmatmul.msk.f32.gmra.mxu2 %vm890_vm11, %v1489_v45  ;;  %1383 = vmatmul.msk.f32.gmra.mxu1 %vm891_vm12, %v1489_v45  ;;  %vm920_vm11 = vcmp.eq.s32.totalorder %v2027_v47, %v2085_v16  ;;  %vm902_vm12 = vcmp.eq.s32.totalorder %v1932_v32, %v2085_v16 }
 0x172   : > { %1431 = vmatmul.msk.f32.vlgmr.msra.gmra.mxu3 %vm916_vm5, %v1489_v45  ;;  %vm911_vm5 = vcmp.eq.s32.totalorder %v2414_v19, %v2045_v31 }
 0x178   : > { %1419 = vmatmul.msk.f32.gmra.mxu2 %vm892_vm15, %v1489_v45  ;;  %1384 = vmatmul.msk.f32.gmra.mxu1 %vm893_vm0, %v1489_v45  ;;  %vm904_vm15 = vcmp.eq.s32.totalorder %v2410_v57, %v2085_v16  ;;  %vm905_vm0 = vcmp.eq.s32.totalorder %v2411_v9, %v2045_v31 }
 0x17a   : > { %1432 = vmatmul.msk.f32.gmra.mxu3 %vm918_vm8, %v1489_v45  ;;  %vm914_vm8 = vcmp.eq.s32.totalorder %v2063_v60, %v2085_v16 }
 0x180   : > { %1420 = vmatmul.msk.f32.gmra.mxu2 %vm894_vm1, %v1489_v45  ;;  %1385 = vmatmul.msk.f32.gmra.mxu1 %vm895_vm14, %v1489_v45  ;;  %vm907_vm1 = vcmp.eq.s32.totalorder %v2412_v15, %v2045_v31  ;;  %vm908_vm14 = vcmp.eq.s32.totalorder %v2412_v15, %v2085_v16 }
 0x182   : > { %1433 = vmatmul.msk.f32.gmra.mxu3 %vm920_vm11, %v1489_v45 }
 0x188   : > { %1421 = vmatmul.msk.f32.gmra.mxu2 %vm896_vm3, %v1489_v45  ;;  %1386 = vmatmul.msk.f32.gmra.mxu1 %vm897_vm4, %v1489_v45  ;;  %vm909_vm3 = vcmp.eq.s32.totalorder %v2413_v18, %v2045_v31  ;;  %vm910_vm4 = vcmp.eq.s32.totalorder %v2413_v18, %v2085_v16 }
 0x190   : > { %1422 = vmatmul.msk.f32.gmra.mxu2 %vm898_vm6, %v1489_v45  ;;  %1387 = vmatmul.msk.f32.gmra.mxu1 %vm899_vm7, %v1489_v45  ;;  %vm912_vm6 = vcmp.eq.s32.totalorder %v2414_v19, %v2085_v16  ;;  %vm913_vm7 = vcmp.eq.s32.totalorder %v2063_v60, %v2045_v31  ;;  %v1007_v31 = vld [vmem:[%s2394_s5 + $0x30] sm:$0xff]  ;;  %v1020_v19 = vld [vmem:[%s2394_s5 + $0x98] sm:$0xff] }
 0x198   : > { %1423 = vmatmul.msk.f32.gmra.mxu2 %vm900_vm9, %v1489_v45  ;;  %1388 = vmatmul.msk.f32.gmra.mxu1 %vm901_vm10, %v1489_v45  ;;  %vm1195_vm9 = vcmask 523264  }
 0x1a0   : > { %1424 = vmatmul.msk.f32.gmra.mxu2 %vm902_vm12, %v1489_v45  ;;  %1389 = vmatmul.msk.f32.gmra.mxu1 %vm903_vm13, %v1489_v45 }
 0x1a8   : > { %1425 = vmatmul.msk.f32.gmra.mxu2 %vm904_vm15, %v1489_v45  ;;  %1390 = vmatmul.msk.f32.gmra.mxu1 %vm905_vm0, %v1489_v45 }
 0x1b0   : > { %1426 = vmatmul.msk.f32.gmra.mxu2 %vm906_vm2, %v1489_v45  ;;  %1391 = vmatmul.msk.f32.gmra.mxu1 %vm907_vm1, %v1489_v45 }
 0x1b8   : > { %1427 = vmatmul.msk.f32.gmra.mxu2 %vm908_vm14, %v1489_v45  ;;  %1392 = vmatmul.msk.f32.gmra.mxu1 %vm909_vm3, %v1489_v45 }
 0x1c0   : > { %1428 = vmatmul.msk.f32.gmra.mxu2 %vm910_vm4, %v1489_v45  ;;  %1393 = vmatmul.msk.f32.gmra.mxu1 %vm911_vm5, %v1489_v45 }
 0x1c5   : > { %v1038_v22 = vpop.f32.mrf.mxu1 }
 0x1c8   : > { %1429 = vmatmul.msk.f32.gmra.mxu2 %vm912_vm6, %v1489_v45  ;;  %1394 = vmatmul.msk.f32.gmra.mxu1 %vm913_vm7, %v1489_v45 }
 0x1cd   : > { %v1041_v24 = vpop.f32.mrf.mxu1 }
 0x1d0   : > { %1430 = vmatmul.msk.f32.gmra.mxu2 %vm914_vm8, %v1489_v45 }
 0x1d3   : > { %v1115_v29 = vpop.f32.mrf.mxu2 }
 0x1d4   : > { %v1116_v35 = vadd.f32 %v1115_v29, %v1038_v22  ;;  %v1011_v29 = vld [vmem:[%s2394_s5 + $0x50] sm:$0xff] }
 0x1d5   : > { %v1044_v48 = vpop.f32.mrf.mxu1 }
 0x1d6   : > { %v1175_v56 = vadd.f32 %v1116_v35, %v1001_v26 }
 0x1d8   : > { %1196 = vst.msk [vmem:[%s2394_s5] sm:$0xff] %vm1195_vm9, %v1175_v56 }
 0x1db   : > { %v1118_v46 = vpop.f32.mrf.mxu2 }
 0x1dc   : > { %v1119_v6 = vadd.f32 %v1118_v46, %v1041_v24  ;;  %v1012_v46 = vld [vmem:[%s2394_s5 + $0x58] sm:$0xff] }
 0x1dd   : > { %v1047_v12 = vpop.f32.mrf.mxu1  ;;  %v1089_v63 = vpop.f32.mrf.mxu3 }
 0x1de   : > { %v1176_v44 = vadd.f32 %v1119_v6, %v1002_v0 }
 0x1e0   : > { %1197 = vst.msk [vmem:[%s2394_s5 + $0x8] sm:$0xff] %vm1195_vm9, %v1176_v44 }
 0x1e3   : > { %v1121_v23 = vpop.f32.mrf.mxu2 }
 0x1e4   : > { %v1122_v39 = vadd.f32 %v1121_v23, %v1044_v48 }
 0x1e5   : > { %v1050_v36 = vpop.f32.mrf.mxu1  ;;  %v1092_v42 = vpop.f32.mrf.mxu3 }
 0x1e6   : > { %v1177_v28 = vadd.f32 %v1122_v39, %v1003_v17  ;;  %v1013_v17 = vld [vmem:[%s2394_s5 + $0x60] sm:$0xff] }
 0x1e8   : > { %1198 = vst.msk [vmem:[%s2394_s5 + $0x10] sm:$0xff] %vm1195_vm9, %v1177_v28 }
 0x1eb   : > { %v1124_v60 = vpop.f32.mrf.mxu2 }
 0x1ec   : > { %v1125_v62 = vadd.f32 %v1124_v60, %v1047_v12 }
 0x1ed   : > { %v1053_v32 = vpop.f32.mrf.mxu1  ;;  %v1095_v34 = vpop.f32.mrf.mxu3 }
 0x1ee   : > { %v1178_v5 = vadd.f32 %v1125_v62, %v1004_v50  ;;  %v1014_v50 = vld [vmem:[%s2394_s5 + $0x68] sm:$0xff] }
 0x1f0   : > { %1199 = vst.msk [vmem:[%s2394_s5 + $0x18] sm:$0xff] %vm1195_vm9, %v1178_v5 }
 0x1f3   : > { %v1127_v10 = vpop.f32.mrf.mxu2 }
 0x1f4   : > { %v1128_v25 = vadd.f32 %v1127_v10, %v1050_v36 }
 0x1f5   : > { %v1056_v14 = vpop.f32.mrf.mxu1  ;;  %v1166_v54 = vpop.f32.mrf.mxu3 }
 0x1f6   : > { %v1179_v52 = vadd.f32 %v1128_v25, %v1005_v7  ;;  %v1167_v37 = vadd.f32 %v1166_v54, %v1089_v63  ;;  %v1015_v63 = vld [vmem:[%s2394_s5 + $0x70] sm:$0xff] }
 0x1f8   : > { %1200 = vst.msk [vmem:[%s2394_s5 + $0x20] sm:$0xff] %vm1195_vm9, %v1179_v52  ;;  %v1192_v55 = vadd.f32 %v1167_v37, %v1018_v49 }
 0x1fa   : > { %1213 = vst.msk [vmem:[%s2394_s5 + $0x88] sm:$0xff] %vm1195_vm9, %v1192_v55 }
 0x1fb   : > { %v1130_v53 = vpop.f32.mrf.mxu2 }
 0x1fc   : > { %v1131_v8 = vadd.f32 %v1130_v53, %v1053_v32 }
 0x1fd   : > { %v1059_v3 = vpop.f32.mrf.mxu1  ;;  %v1169_v13 = vpop.f32.mrf.mxu3 }
 0x1fe   : > { %v1180_v47 = vadd.f32 %v1131_v8, %v1006_v38  ;;  %v1170_v4 = vadd.f32 %v1169_v13, %v1092_v42 }
 0x200   : > { %1201 = vst.msk [vmem:[%s2394_s5 + $0x28] sm:$0xff] %vm1195_vm9, %v1180_v47  ;;  %v1193_v2 = vadd.f32 %v1170_v4, %v1019_v41  ;;  %v1017_v47 = vld [vmem:[%s2394_s5 + $0x80] sm:$0xff] }
 0x202   : > { %1214 = vst.msk [vmem:[%s2394_s5 + $0x90] sm:$0xff] %vm1195_vm9, %v1193_v2 }
 0x203   : > { %v1133_v51 = vpop.f32.mrf.mxu2 }
 0x204   : > { %v1134_v11 = vadd.f32 %v1133_v51, %v1056_v14  ;;  %v1016_v14 = vld [vmem:[%s2394_s5 + $0x78] sm:$0xff] }
 0x205   : > { %v1062_v59 = vpop.f32.mrf.mxu1  ;;  %v1172_v9 = vpop.f32.mrf.mxu3 }
 0x206   : > { %v1181_v43 = vadd.f32 %v1134_v11, %v1007_v31  ;;  %v1173_v18 = vadd.f32 %v1172_v9, %v1095_v34 }
 0x208   : > { %1202 = vst.msk [vmem:[%s2394_s5 + $0x30] sm:$0xff] %vm1195_vm9, %v1181_v43  ;;  %v1194_v24 = vadd.f32 %v1173_v18, %v1020_v19 }
 0x20a   : > { %1215 = vst.msk [vmem:[%s2394_s5 + $0x98] sm:$0xff] %vm1195_vm9, %v1194_v24 }
 0x20b   : > { %v1136_v27 = vpop.f32.mrf.mxu2 }
 0x20c   : > { %v1137_v40 = vadd.f32 %v1136_v27, %v1059_v3 }
 0x20d   : > { %v1065_v21 = vpop.f32.mrf.mxu1 }
 0x20e   : > { %v1182_v58 = vadd.f32 %v1137_v40, %v1008_v30 }
 0x210   : > { %1203 = vst.msk [vmem:[%s2394_s5 + $0x38] sm:$0xff] %vm1195_vm9, %v1182_v58 }
 0x213   : > { %v1139_v33 = vpop.f32.mrf.mxu2 }
 0x214   : > { %v1140_v45 = vadd.f32 %v1139_v33, %v1062_v59 }
 0x215   : > { %v1068_v20 = vpop.f32.mrf.mxu1 }
 0x216   : > { %v1183_v16 = vadd.f32 %v1140_v45, %v1009_v1 }
 0x218   : > { %1204 = vst.msk [vmem:[%s2394_s5 + $0x40] sm:$0xff] %vm1195_vm9, %v1183_v16 }
 0x21b   : > { %v1142_v57 = vpop.f32.mrf.mxu2 }
 0x21c   : > { %v1143_v15 = vadd.f32 %v1142_v57, %v1065_v21 }
 0x21d   : > { %v1071_v26 = vpop.f32.mrf.mxu1 }
 0x21e   : > { %v1184_v22 = vadd.f32 %v1143_v15, %v1010_v61 }
 0x220   : > { %1205 = vst.msk [vmem:[%s2394_s5 + $0x48] sm:$0xff] %vm1195_vm9, %v1184_v22 }
 0x223   : > { %v1145_v35 = vpop.f32.mrf.mxu2 }
 0x224   : > { %v1146_v56 = vadd.f32 %v1145_v35, %v1068_v20 }
 0x225   : > { %v1074_v0 = vpop.f32.mrf.mxu1 }
 0x226   : > { %v1185_v48 = vadd.f32 %v1146_v56, %v1011_v29 }
 0x228   : > { %1206 = vst.msk [vmem:[%s2394_s5 + $0x50] sm:$0xff] %vm1195_vm9, %v1185_v48 }
 0x22b   : > { %v1148_v6 = vpop.f32.mrf.mxu2 }
 0x22c   : > { %v1149_v44 = vadd.f32 %v1148_v6, %v1071_v26 }
 0x22d   : > { %v1077_v39 = vpop.f32.mrf.mxu1 }
 0x22e   : > { %v1186_v12 = vadd.f32 %v1149_v44, %v1012_v46 }
 0x230   : > { %1207 = vst.msk [vmem:[%s2394_s5 + $0x58] sm:$0xff] %vm1195_vm9, %v1186_v12 }
 0x233   : > { %v1151_v23 = vpop.f32.mrf.mxu2 }
 0x234   : > { %v1152_v28 = vadd.f32 %v1151_v23, %v1074_v0 }
 0x235   : > { %v1080_v5 = vpop.f32.mrf.mxu1 }
 0x236   : > { %v1187_v36 = vadd.f32 %v1152_v28, %v1013_v17 }
 0x238   : > { %1208 = vst.msk [vmem:[%s2394_s5 + $0x60] sm:$0xff] %vm1195_vm9, %v1187_v36 }
 0x23b   : > { %v1154_v60 = vpop.f32.mrf.mxu2 }
 0x23c   : > { %v1155_v62 = vadd.f32 %v1154_v60, %v1077_v39 }
 0x23d   : > { %v1083_v52 = vpop.f32.mrf.mxu1 }
 0x23e   : > { %v1188_v32 = vadd.f32 %v1155_v62, %v1014_v50 }
 0x240   : > { %1209 = vst.msk [vmem:[%s2394_s5 + $0x68] sm:$0xff] %vm1195_vm9, %v1188_v32 }
 0x243   : > { %v1157_v7 = vpop.f32.mrf.mxu2 }
 0x244   : > { %v1158_v10 = vadd.f32 %v1157_v7, %v1080_v5 }
 0x245   : > { %v1086_v8 = vpop.f32.mrf.mxu1 }
 0x246   : > { %v1189_v25 = vadd.f32 %v1158_v10, %v1015_v63 }
 0x248   : > { %1210 = vst.msk [vmem:[%s2394_s5 + $0x70] sm:$0xff] %vm1195_vm9, %v1189_v25 }
 0x24b   : > { %v1160_v42 = vpop.f32.mrf.mxu2 }
 0x24c   : > { %v1161_v38 = vadd.f32 %v1160_v42, %v1083_v52 }
 0x24e   : > { %v1190_v53 = vadd.f32 %v1161_v38, %v1016_v14 }
 0x250   : > { %1211 = vst.msk [vmem:[%s2394_s5 + $0x78] sm:$0xff] %vm1195_vm9, %v1190_v53 }
 0x253   : > { %v1163_v3 = vpop.f32.mrf.mxu2 }
 0x254   : > { %v1164_v34 = vadd.f32 %v1163_v3, %v1086_v8 }
 0x256   : > { %v1191_v31 = vadd.f32 %v1164_v34, %v1017_v47 }
 0x258   : > { %1212 = vst.msk [vmem:[%s2394_s5 + $0x80] sm:$0xff] %vm1195_vm9, %v1191_v31 }
 0x259 PF: > { %s15_s18 = sadd.s32 1, %s1486_s18  }
 0x25a   : > { %p12_p6 = scmp.ge.s32.totalorder %s15_s18, 5  }
 0x25c   :  { %14 = sbr.rel (!%p12_p6) target bundleno = 1 (0x1), region = 79 }

</bundles_post_ra>
